<compile_context>
chip_gen: v5e
topology: v5e:2x2
jax: 0.10.0
libtpu: 0.0.40
codegen_flags: <defaults>
</compile_context>

<pallas_src>
import math

import jax
import jax.numpy as jnp
from jax import lax
from jax.experimental import pallas as pl
from jax.experimental.pallas import tpu as pltpu

NUM_SWEEPS = 40     # fixed Gauss-Seidel sweeps (SATNet default max_iter)
_EPS = 1e-12
_EPS_SQ = 1e-24     # rsqrt(max(||g||^2, _EPS_SQ)) == 1/max(||g||, 1e-12)


def _make_satnet_mixing_kernel(Np, LB):
  """Builds the mixing-method kernel for static sizes (Np variables, LB lanes)."""
  nb = Np // 8

  def kernel(omega_ref, blkdiag_ref, msel_ref, cpz_ref, spz_ref, free_ref,
             r_ref, y_ref, v_ref):
    # omega_ref   (Np, Np) : Omega = S S^T with zero diagonal (per-model const)
    # blkdiag_ref (Np, 8)  : row i -> Omega[i, (i//8)*8 : (i//8)*8 + 8]
    # msel_ref    (LB, LB) : block-diag chunk selector (per-batch-chunk sum/broadcast)
    # cpz_ref     (Np, LB) : cos(pi*z) expanded to lanes
    # spz_ref     (Np, LB) : sin(pi*z) expanded to lanes
    # free_ref    (Np, LB) : 1.0 where variable is free (outputs/aux), 0.0 fixed
    # r_ref       (Np, LB) : deterministic gaussian init directions
    # y_ref       (Np, LB) : OUT  clip(-v_i . v_truth, -1, 1), broadcast per chunk
    # v_ref       (Np, LB) : scratch relaxation vectors

    M = msel_ref[...]
    R = r_ref[...]
    free = free_ref[...]

    # ---- init V (fully vectorized over variables/lanes; runs once per step) ----
    r0 = R[0:1, :]
    v0 = r0 * lax.rsqrt(
        jnp.dot(r0 * r0, M, preferred_element_type=jnp.float32) + _EPS)
    proj = jnp.dot(R * v0, M, preferred_element_type=jnp.float32)
    perp = R - proj * v0
    perp = perp * lax.rsqrt(
        jnp.dot(perp * perp, M, preferred_element_type=jnp.float32) + _EPS)
    rnd = R * lax.rsqrt(
        jnp.dot(R * R, M, preferred_element_type=jnp.float32) + _EPS)
    v_known = -cpz_ref[...] * v0 + spz_ref[...] * perp
    v_ref[...] = free * rnd + (1.0 - free) * v_known
    v_ref[0:1, :] = v0                         # exact truth direction

    # ---- blocked Gauss-Seidel coordinate descent over variables ----
    def block_step(p, carry):
      row = pl.multiple_of(p * 8, 8)
      W = omega_ref[pl.ds(row, 8), :]          # (8, Np)  aligned sublane slab
      D = blkdiag_ref[pl.ds(row, 8), :]        # (8, 8)   own diag block, diag=0
      v_old = v_ref[pl.ds(row, 8), :]          # (8, LB)
      fm = free_ref[pl.ds(row, 8), :]          # (8, LB)
      # one MXU matmul per 8 variables (Omega diag is zero => no sii correction)
      G = jnp.dot(W, v_ref[...], preferred_element_type=jnp.float32)  # (8, LB)

      new_rows = []
      for r in range(8):                       # static unroll within the block
        g = G[r:r + 1, :]                                            # (1, LB)
        # per-batch-chunk ||g||^2, broadcast back to lanes, via selector matmul
        sq = jnp.dot(g * g, M, preferred_element_type=jnp.float32)   # (1, LB)
        v_cand = -g * lax.rsqrt(jnp.maximum(sq, _EPS_SQ))
        f = fm[r:r + 1, :]
        vo = v_old[r:r + 1, :]
        v_new = f * v_cand + (1.0 - f) * vo
        # exact triangular correction: keep Gauss-Seidel semantics within block
        G = G + D[:, r:r + 1] * (v_new - vo)
        new_rows.append(v_new)
      # one lane-dense, sublane-aligned (8, LB) store per block
      v_ref[pl.ds(row, 8), :] = jnp.concatenate(new_rows, axis=0)
      return carry

    def sweep(t, carry):
      return lax.fori_loop(0, nb, block_step, carry)

    lax.fori_loop(0, NUM_SWEEPS, sweep, 0)

    # ---- readout: y_i = clip(-v_i . v_truth, -1, 1), single lane-dense store ----
    V = v_ref[...]
    vt = v_ref[0:1, :]
    dots = jnp.dot(V * vt, M, preferred_element_type=jnp.float32)
    y_ref[...] = jnp.clip(-dots, -1.0, 1.0)

  return kernel


class SATConvPallas:
  """Pallas/JAX re-implementation of SATConv.forward."""

  def __init__(self, in_n, out_n, m=200, aux=0, key=None):
    self.in_n = in_n
    self.out_n = out_n
    self.aux = aux
    self.m = m
    # total variables: 1 truth + user vars (in_n + out_n) + aux
    self.N = 1 + in_n + out_n + aux
    # embedding dim k > sqrt(2N) (SATNet rule)
    self.k = int(math.floor(math.sqrt(2.0 * self.N))) + 1
    # pad variables to a multiple of 8 (sublane alignment)
    self.Np = ((self.N + 7) // 8) * 8

    # lane packing: each batch slot owns kp = next_pow2(k) lanes; 128-lane slabs
    kp = 1
    while kp < self.k:
      kp *= 2
    self.kp = kp
    if kp >= 128:
      self.LB, self.bpb = kp, 1            # kp is a pow2 >= 128 => multiple of 128
    else:
      self.LB, self.bpb = 128, 128 // kp

    if key is None:
      key = jax.random.PRNGKey(0)
    k_s, self.k_init = jax.random.split(key)
    # deterministic clause-matrix init (synthetic; SATNet uses a scaled normal)
    self.S = (jax.random.normal(k_s, (self.N, m), dtype=jnp.float32)
              * (0.5 / math.sqrt(self.N + m)))

    # Omega = S S^T with zero diagonal, padded: per-model constant (computed once)
    omega = self.S @ self.S.T
    omega = omega * (1.0 - jnp.eye(self.N, dtype=jnp.float32))
    omega_p = jnp.zeros((self.Np, self.Np), jnp.float32)
    omega_p = omega_p.at[:self.N, :self.N].set(omega)
    self.omega = omega_p
    nb = self.Np // 8
    self.blkdiag = jnp.concatenate(
        [omega_p[p * 8:(p + 1) * 8, p * 8:(p + 1) * 8] for p in range(nb)],
        axis=0)                                                   # (Np, 8)

    # chunk selector: k x k block of ones per kp-wide batch slot, identity on
    # the intra-slot pad lanes (keeps padding isolated and numerically tame).
    lane = jnp.arange(self.LB)
    chunk = lane // kp
    off = lane % kp
    real = off < self.k
    same = (chunk[:, None] == chunk[None, :]) & real[:, None] & real[None, :]
    self.msel = same.astype(jnp.float32) + jnp.diag((~real).astype(jnp.float32))

  def __call__(self, x_in):
    # mirror the PyTorch squeeze of a leading singleton dim
    if x_in.ndim == 3 and x_in.shape[0] == 1:
      x_in = jnp.squeeze(x_in, axis=0)
    x_in = x_in.astype(jnp.float32)
    B = x_in.shape[0]
    N, Np, kp, LB, bpb = self.N, self.Np, self.kp, self.LB, self.bpb
    in_n, out_n, aux = self.in_n, self.out_n, self.aux

    num_blocks = -(-B // bpb)                 # ceil(B / batches-per-slab)
    Bp = num_blocks * bpb                     # padded batch slots
    Ltot = num_blocks * LB                    # total lanes

    # per-batch variable vector z: [truth=1, inputs, outputs=0, aux=0]
    z = jnp.concatenate(
        [jnp.ones((B, 1), jnp.float32), x_in,
         jnp.zeros((B, out_n + aux), jnp.float32)], axis=-1)          # (B, N)
    # free = 1 for outputs/aux, 0 for truth+inputs; padded vars/batches are fixed
    freeb = jnp.concatenate(
        [jnp.zeros((B, 1 + in_n), jnp.float32),
         jnp.ones((B, out_n + aux), jnp.float32)], axis=-1)           # (B, N)
    z_p = jnp.zeros((Bp, Np), jnp.float32).at[:B, :N].set(z)
    free_p = jnp.zeros((Bp, Np), jnp.float32).at[:B, :N].set(freeb)

    cpz = jnp.cos(jnp.pi * z_p).T             # (Np, Bp)
    spz = jnp.sin(jnp.pi * z_p).T
    freeT = free_p.T
    # expand each batch slot to its kp lanes (lane-dense layout)
    cpz_e = jnp.repeat(cpz, kp, axis=1)       # (Np, Ltot)
    spz_e = jnp.repeat(spz, kp, axis=1)
    free_e = jnp.repeat(freeT, kp, axis=1)

    R = jax.random.normal(self.k_init, (Np, Ltot), dtype=jnp.float32)

    kernel = _make_satnet_mixing_kernel(Np, LB)
    lane_spec = pl.BlockSpec((Np, LB), lambda i: (0, i))
    full_spec = lambda shape: pl.BlockSpec(shape, lambda i: (0, 0))

    y_full = pl.pallas_call(
        kernel,
        out_shape=jax.ShapeDtypeStruct((Np, Ltot), jnp.float32),
        grid_spec=pltpu.PrefetchScalarGridSpec(
            num_scalar_prefetch=0,
            grid=(num_blocks,),
            in_specs=[
                full_spec((Np, Np)),     # Omega (zero diag)
                full_spec((Np, 8)),      # 8x8 diagonal blocks of Omega
                full_spec((LB, LB)),     # chunk selector
                lane_spec,               # cos(pi z)
                lane_spec,               # sin(pi z)
                lane_spec,               # free mask
                lane_spec,               # random init directions
            ],
            out_specs=lane_spec,
            scratch_shapes=[pltpu.VMEM((Np, LB), jnp.float32)],   # V
        ),
        compiler_params=pltpu.CompilerParams(
            dimension_semantics=("parallel",)),   # batch slabs -> v7x megacore
    )(self.omega, self.blkdiag, self.msel, cpz_e, spz_e, free_e, R)

    # take lane 0 of each real batch chunk (all real lanes of a chunk are equal)
    cols = jnp.arange(B) * kp
    y = y_full[:, cols]                         # (Np, B)
    # epilogue glue: probabilities z_i = arccos(-v_i . v_truth) / pi
    z_all = (jnp.arccos(y) / jnp.pi).T          # (B, Np)
    # SATNet returns user variables (excluding truth & aux); SATConv takes last out_n
    return z_all[:, 1 + in_n: 1 + in_n + out_n]


if __name__ == "__main__":
  # small shapes consistent with the module: x_in is (batch, in_n) probabilities
  B, in_n, out_n, m, aux = 2, 16, 8, 64, 0
  key = jax.random.PRNGKey(0)
  k_x, k_param = jax.random.split(key)
  x = jax.random.uniform(k_x, (B, in_n), dtype=jnp.float32)

  model = SATConvPallas(in_n, out_n, m=m, aux=aux, key=k_param)
  out = model(x)
  out = jax.block_until_ready(out)

  assert out.shape == (B, out_n), out.shape
  assert bool(jnp.all(jnp.isfinite(out)))
  assert bool(jnp.all((out >= 0.0) & (out <= 1.0)))
  print("KERNEL_OK")
</pallas_src>

<mosaic_0001>
module attributes {stable_mosaic.version = 11 : i64} {
  func.func @kernel(%arg0: i32, %arg1: memref<32x32xf32, #tpu.memory_space<vmem>>, %arg2: memref<32x8xf32, #tpu.memory_space<vmem>>, %arg3: memref<128x128xf32, #tpu.memory_space<vmem>>, %arg4: memref<32x128xf32, #tpu.memory_space<vmem>>, %arg5: memref<32x128xf32, #tpu.memory_space<vmem>>, %arg6: memref<32x128xf32, #tpu.memory_space<vmem>>, %arg7: memref<32x128xf32, #tpu.memory_space<vmem>>, %arg8: memref<32x128xf32, #tpu.memory_space<vmem>>, %arg9: memref<32x128xf32, #tpu.memory_space<vmem>>) attributes {dimension_semantics = [#tpu.dimension_semantics<parallel>], iteration_bounds = array<i64: 1>, scalar_prefetch = 0 : i64, scratch_operands = 1 : i64, tpu.core_type = #tpu.core_type<tc>, window_params = [{pipeline_mode = #tpu.pipeline_mode<synchronous>, transform_indices = @transform_0, window_bounds = array<i64: 32, 32>}, {pipeline_mode = #tpu.pipeline_mode<synchronous>, transform_indices = @transform_1, window_bounds = array<i64: 32, 8>}, {pipeline_mode = #tpu.pipeline_mode<synchronous>, transform_indices = @transform_2, window_bounds = array<i64: 128, 128>}, {transform_indices = @transform_3, window_bounds = array<i64: 32, 128>}, {transform_indices = @transform_4, window_bounds = array<i64: 32, 128>}, {transform_indices = @transform_5, window_bounds = array<i64: 32, 128>}, {transform_indices = @transform_6, window_bounds = array<i64: 32, 128>}, {transform_indices = @transform_7, window_bounds = array<i64: 32, 128>}]} {
    %c0 = arith.constant 0 : index
    %c0_0 = arith.constant 0 : index
    %0 = vector.load %arg3[%c0, %c0_0] : memref<128x128xf32, #tpu.memory_space<vmem>>, vector<128x128xf32>
    %c0_1 = arith.constant 0 : index
    %c0_2 = arith.constant 0 : index
    %1 = vector.load %arg7[%c0_1, %c0_2] : memref<32x128xf32, #tpu.memory_space<vmem>>, vector<32x128xf32>
    %c0_3 = arith.constant 0 : index
    %c0_4 = arith.constant 0 : index
    %2 = vector.load %arg6[%c0_3, %c0_4] : memref<32x128xf32, #tpu.memory_space<vmem>>, vector<32x128xf32>
    %3 = vector.extract_strided_slice %1 {offsets = [0, 0], sizes = [1, 128], strides = [1, 1]} : vector<32x128xf32> to vector<1x128xf32>
    %4 = arith.mulf %3, %3 : vector<1x128xf32>
    %cst = arith.constant dense<0.000000e+00> : vector<1x128xf32>
    %5 = tpu.matmul %4, %0, %cst {dimension_numbers = #tpu.dot_dimension_numbers<[1], [0], [0], [1], [0, 0, 1, 1], [], []>} : vector<1x128xf32>, vector<128x128xf32>, vector<1x128xf32> -> vector<1x128xf32>
    %cst_5 = arith.constant 9.99999996E-13 : f32
    %6 = vector.broadcast %cst_5 : f32 to vector<1x128xf32>
    %7 = arith.addf %5, %6 : vector<1x128xf32>
    %8 = math.rsqrt %7 : vector<1x128xf32>
    %9 = arith.mulf %3, %8 : vector<1x128xf32>
    %10 = vector.broadcast %9 : vector<1x128xf32> to vector<32x128xf32>
    %11 = arith.mulf %1, %10 : vector<32x128xf32>
    %cst_6 = arith.constant dense<0.000000e+00> : vector<32x128xf32>
    %12 = tpu.matmul %11, %0, %cst_6 {dimension_numbers = #tpu.dot_dimension_numbers<[1], [0], [0], [1], [0, 0, 1, 1], [], []>} : vector<32x128xf32>, vector<128x128xf32>, vector<32x128xf32> -> vector<32x128xf32>
    %13 = vector.broadcast %9 : vector<1x128xf32> to vector<32x128xf32>
    %14 = arith.mulf %12, %13 : vector<32x128xf32>
    %15 = arith.subf %1, %14 : vector<32x128xf32>
    %16 = arith.mulf %15, %15 : vector<32x128xf32>
    %cst_7 = arith.constant dense<0.000000e+00> : vector<32x128xf32>
    %17 = tpu.matmul %16, %0, %cst_7 {dimension_numbers = #tpu.dot_dimension_numbers<[1], [0], [0], [1], [0, 0, 1, 1], [], []>} : vector<32x128xf32>, vector<128x128xf32>, vector<32x128xf32> -> vector<32x128xf32>
    %cst_8 = arith.constant 9.99999996E-13 : f32
    %18 = vector.broadcast %cst_8 : f32 to vector<32x128xf32>
    %19 = arith.addf %17, %18 : vector<32x128xf32>
    %20 = math.rsqrt %19 : vector<32x128xf32>
    %21 = arith.mulf %15, %20 : vector<32x128xf32>
    %22 = arith.mulf %1, %1 : vector<32x128xf32>
    %cst_9 = arith.constant dense<0.000000e+00> : vector<32x128xf32>
    %23 = tpu.matmul %22, %0, %cst_9 {dimension_numbers = #tpu.dot_dimension_numbers<[1], [0], [0], [1], [0, 0, 1, 1], [], []>} : vector<32x128xf32>, vector<128x128xf32>, vector<32x128xf32> -> vector<32x128xf32>
    %cst_10 = arith.constant 9.99999996E-13 : f32
    %24 = vector.broadcast %cst_10 : f32 to vector<32x128xf32>
    %25 = arith.addf %23, %24 : vector<32x128xf32>
    %26 = math.rsqrt %25 : vector<32x128xf32>
    %27 = arith.mulf %1, %26 : vector<32x128xf32>
    %c0_11 = arith.constant 0 : index
    %c0_12 = arith.constant 0 : index
    %28 = vector.load %arg4[%c0_11, %c0_12] : memref<32x128xf32, #tpu.memory_space<vmem>>, vector<32x128xf32>
    %cst_13 = arith.constant 0.000000e+00 : f32
    %29 = vector.broadcast %cst_13 : f32 to vector<32x128xf32>
    %30 = arith.subf %29, %28 : vector<32x128xf32>
    %31 = vector.broadcast %9 : vector<1x128xf32> to vector<32x128xf32>
    %32 = arith.mulf %30, %31 : vector<32x128xf32>
    %c0_14 = arith.constant 0 : index
    %c0_15 = arith.constant 0 : index
    %33 = vector.load %arg5[%c0_14, %c0_15] : memref<32x128xf32, #tpu.memory_space<vmem>>, vector<32x128xf32>
    %34 = arith.mulf %33, %21 : vector<32x128xf32>
    %35 = arith.addf %32, %34 : vector<32x128xf32>
    %36 = arith.mulf %2, %27 : vector<32x128xf32>
    %cst_16 = arith.constant 1.000000e+00 : f32
    %37 = vector.broadcast %cst_16 : f32 to vector<32x128xf32>
    %38 = arith.subf %37, %2 : vector<32x128xf32>
    %39 = arith.mulf %38, %35 : vector<32x128xf32>
    %40 = arith.addf %36, %39 : vector<32x128xf32>
    %c0_17 = arith.constant 0 : index
    %c0_18 = arith.constant 0 : index
    %41 = vector.load %arg9[%c0_17, %c0_18] : memref<32x128xf32, #tpu.memory_space<vmem>>, vector<32x128xf32>
    tpu.vector_store %arg9[%c0_17, %c0_18], %40 {strides = array<i32>} : memref<32x128xf32, #tpu.memory_space<vmem>>, vector<32x128xf32>,
    %c0_19 = arith.constant 0 : index
    %c0_20 = arith.constant 0 : index
    %42 = vector.load %arg9[%c0_19, %c0_20] : memref<32x128xf32, #tpu.memory_space<vmem>>, vector<1x128xf32>
    tpu.vector_store %arg9[%c0_19, %c0_20], %9 {strides = array<i32>} : memref<32x128xf32, #tpu.memory_space<vmem>>, vector<1x128xf32>,
    %c0_i32 = arith.constant 0 : i32
    %c40_i32 = arith.constant 40 : i32
    %43 = arith.addi %c0_i32, %c40_i32 : i32
    %c1_i32 = arith.constant 1 : i32
    scf.for %arg10 = %c0_i32 to %43 step %c1_i32  : i32 {
      %c0_i32_31 = arith.constant 0 : i32
      %c4_i32 = arith.constant 4 : i32
      %56 = arith.addi %c0_i32_31, %c4_i32 : i32
      %c1_i32_32 = arith.constant 1 : i32
      scf.for %arg11 = %c0_i32_31 to %56 step %c1_i32_32  : i32 {
        %c8_i32 = arith.constant 8 : i32
        %57 = arith.muli %arg11, %c8_i32 : i32
        %58 = tpu.assume_multiple %57, 8 : i32
        %59 = arith.index_cast %58 : i32 to index
        %c0_34 = arith.constant 0 : index
        %60 = vector.load %arg1[%59, %c0_34] : memref<32x32xf32, #tpu.memory_space<vmem>>, vector<8x32xf32>
        %61 = arith.index_cast %58 : i32 to index
        %c0_35 = arith.constant 0 : index
        %62 = vector.load %arg2[%61, %c0_35] : memref<32x8xf32, #tpu.memory_space<vmem>>, vector<8x8xf32>
        %63 = arith.index_cast %58 : i32 to index
        %c0_36 = arith.constant 0 : index
        %64 = vector.load %arg9[%63, %c0_36] : memref<32x128xf32, #tpu.memory_space<vmem>>, vector<8x128xf32>
        %65 = arith.index_cast %58 : i32 to index
        %c0_37 = arith.constant 0 : index
        %66 = vector.load %arg6[%65, %c0_37] : memref<32x128xf32, #tpu.memory_space<vmem>>, vector<8x128xf32>
        %c0_38 = arith.constant 0 : index
        %c0_39 = arith.constant 0 : index
        %67 = vector.load %arg9[%c0_38, %c0_39] : memref<32x128xf32, #tpu.memory_space<vmem>>, vector<32x128xf32>
        %cst_40 = arith.constant dense<0.000000e+00> : vector<8x128xf32>
        %68 = tpu.matmul %60, %67, %cst_40 {dimension_numbers = #tpu.dot_dimension_numbers<[1], [0], [0], [1], [0, 0, 1, 1], [], []>} : vector<8x32xf32>, vector<32x128xf32>, vector<8x128xf32> -> vector<8x128xf32>
        %69 = vector.extract_strided_slice %68 {offsets = [0, 0], sizes = [1, 128], strides = [1, 1]} : vector<8x128xf32> to vector<1x128xf32>
        %70 = arith.mulf %69, %69 : vector<1x128xf32>
        %cst_41 = arith.constant dense<0.000000e+00> : vector<1x128xf32>
        %71 = tpu.matmul %70, %0, %cst_41 {dimension_numbers = #tpu.dot_dimension_numbers<[1], [0], [0], [1], [0, 0, 1, 1], [], []>} : vector<1x128xf32>, vector<128x128xf32>, vector<1x128xf32> -> vector<1x128xf32>
        %cst_42 = arith.constant 0.000000e+00 : f32
        %72 = vector.broadcast %cst_42 : f32 to vector<1x128xf32>
        %73 = arith.subf %72, %69 : vector<1x128xf32>
        %cst_43 = arith.constant 1.000000e-24 : f32
        %74 = vector.broadcast %cst_43 : f32 to vector<1x128xf32>
        %75 = arith.maximumf %71, %74 : vector<1x128xf32>
        %76 = math.rsqrt %75 : vector<1x128xf32>
        %77 = arith.mulf %73, %76 : vector<1x128xf32>
        %78 = vector.extract_strided_slice %66 {offsets = [0, 0], sizes = [1, 128], strides = [1, 1]} : vector<8x128xf32> to vector<1x128xf32>
        %79 = vector.extract_strided_slice %64 {offsets = [0, 0], sizes = [1, 128], strides = [1, 1]} : vector<8x128xf32> to vector<1x128xf32>
        %80 = arith.mulf %78, %77 : vector<1x128xf32>
        %cst_44 = arith.constant 1.000000e+00 : f32
        %81 = vector.broadcast %cst_44 : f32 to vector<1x128xf32>
        %82 = arith.subf %81, %78 : vector<1x128xf32>
        %83 = arith.mulf %82, %79 : vector<1x128xf32>
        %84 = arith.addf %80, %83 : vector<1x128xf32>
        %85 = vector.extract_strided_slice %62 {offsets = [0, 0], sizes = [8, 1], strides = [1, 1]} : vector<8x8xf32> to vector<8x1xf32>
        %86 = arith.subf %84, %79 : vector<1x128xf32>
        %87 = vector.broadcast %85 : vector<8x1xf32> to vector<8x128xf32>
        %88 = vector.broadcast %86 : vector<1x128xf32> to vector<8x128xf32>
        %89 = arith.mulf %87, %88 : vector<8x128xf32>
        %90 = arith.addf %68, %89 : vector<8x128xf32>
        %91 = vector.extract_strided_slice %90 {offsets = [1, 0], sizes = [1, 128], strides = [1, 1]} : vector<8x128xf32> to vector<1x128xf32>
        %92 = arith.mulf %91, %91 : vector<1x128xf32>
        %cst_45 = arith.constant dense<0.000000e+00> : vector<1x128xf32>
        %93 = tpu.matmul %92, %0, %cst_45 {dimension_numbers = #tpu.dot_dimension_numbers<[1], [0], [0], [1], [0, 0, 1, 1], [], []>} : vector<1x128xf32>, vector<128x128xf32>, vector<1x128xf32> -> vector<1x128xf32>
        %cst_46 = arith.constant 0.000000e+00 : f32
        %94 = vector.broadcast %cst_46 : f32 to vector<1x128xf32>
        %95 = arith.subf %94, %91 : vector<1x128xf32>
        %cst_47 = arith.constant 1.000000e-24 : f32
        %96 = vector.broadcast %cst_47 : f32 to vector<1x128xf32>
        %97 = arith.maximumf %93, %96 : vector<1x128xf32>
        %98 = math.rsqrt %97 : vector<1x128xf32>
        %99 = arith.mulf %95, %98 : vector<1x128xf32>
        %100 = vector.extract_strided_slice %66 {offsets = [1, 0], sizes = [1, 128], strides = [1, 1]} : vector<8x128xf32> to vector<1x128xf32>
        %101 = vector.extract_strided_slice %64 {offsets = [1, 0], sizes = [1, 128], strides = [1, 1]} : vector<8x128xf32> to vector<1x128xf32>
        %102 = arith.mulf %100, %99 : vector<1x128xf32>
        %cst_48 = arith.constant 1.000000e+00 : f32
        %103 = vector.broadcast %cst_48 : f32 to vector<1x128xf32>
        %104 = arith.subf %103, %100 : vector<1x128xf32>
        %105 = arith.mulf %104, %101 : vector<1x128xf32>
        %106 = arith.addf %102, %105 : vector<1x128xf32>
        %107 = vector.extract_strided_slice %62 {offsets = [0, 1], sizes = [8, 1], strides = [1, 1]} : vector<8x8xf32> to vector<8x1xf32>
        %108 = arith.subf %106, %101 : vector<1x128xf32>
        %109 = vector.broadcast %107 : vector<8x1xf32> to vector<8x128xf32>
        %110 = vector.broadcast %108 : vector<1x128xf32> to vector<8x128xf32>
        %111 = arith.mulf %109, %110 : vector<8x128xf32>
        %112 = arith.addf %90, %111 : vector<8x128xf32>
        %113 = vector.extract_strided_slice %112 {offsets = [2, 0], sizes = [1, 128], strides = [1, 1]} : vector<8x128xf32> to vector<1x128xf32>
        %114 = arith.mulf %113, %113 : vector<1x128xf32>
        %cst_49 = arith.constant dense<0.000000e+00> : vector<1x128xf32>
        %115 = tpu.matmul %114, %0, %cst_49 {dimension_numbers = #tpu.dot_dimension_numbers<[1], [0], [0], [1], [0, 0, 1, 1], [], []>} : vector<1x128xf32>, vector<128x128xf32>, vector<1x128xf32> -> vector<1x128xf32>
        %cst_50 = arith.constant 0.000000e+00 : f32
        %116 = vector.broadcast %cst_50 : f32 to vector<1x128xf32>
        %117 = arith.subf %116, %113 : vector<1x128xf32>
        %cst_51 = arith.constant 1.000000e-24 : f32
        %118 = vector.broadcast %cst_51 : f32 to vector<1x128xf32>
        %119 = arith.maximumf %115, %118 : vector<1x128xf32>
        %120 = math.rsqrt %119 : vector<1x128xf32>
        %121 = arith.mulf %117, %120 : vector<1x128xf32>
        %122 = vector.extract_strided_slice %66 {offsets = [2, 0], sizes = [1, 128], strides = [1, 1]} : vector<8x128xf32> to vector<1x128xf32>
        %123 = vector.extract_strided_slice %64 {offsets = [2, 0], sizes = [1, 128], strides = [1, 1]} : vector<8x128xf32> to vector<1x128xf32>
        %124 = arith.mulf %122, %121 : vector<1x128xf32>
        %cst_52 = arith.constant 1.000000e+00 : f32
        %125 = vector.broadcast %cst_52 : f32 to vector<1x128xf32>
        %126 = arith.subf %125, %122 : vector<1x128xf32>
        %127 = arith.mulf %126, %123 : vector<1x128xf32>
        %128 = arith.addf %124, %127 : vector<1x128xf32>
        %129 = vector.extract_strided_slice %62 {offsets = [0, 2], sizes = [8, 1], strides = [1, 1]} : vector<8x8xf32> to vector<8x1xf32>
        %130 = arith.subf %128, %123 : vector<1x128xf32>
        %131 = vector.broadcast %129 : vector<8x1xf32> to vector<8x128xf32>
        %132 = vector.broadcast %130 : vector<1x128xf32> to vector<8x128xf32>
        %133 = arith.mulf %131, %132 : vector<8x128xf32>
        %134 = arith.addf %112, %133 : vector<8x128xf32>
        %135 = vector.extract_strided_slice %134 {offsets = [3, 0], sizes = [1, 128], strides = [1, 1]} : vector<8x128xf32> to vector<1x128xf32>
        %136 = arith.mulf %135, %135 : vector<1x128xf32>
        %cst_53 = arith.constant dense<0.000000e+00> : vector<1x128xf32>
        %137 = tpu.matmul %136, %0, %cst_53 {dimension_numbers = #tpu.dot_dimension_numbers<[1], [0], [0], [1], [0, 0, 1, 1], [], []>} : vector<1x128xf32>, vector<128x128xf32>, vector<1x128xf32> -> vector<1x128xf32>
        %cst_54 = arith.constant 0.000000e+00 : f32
        %138 = vector.broadcast %cst_54 : f32 to vector<1x128xf32>
        %139 = arith.subf %138, %135 : vector<1x128xf32>
        %cst_55 = arith.constant 1.000000e-24 : f32
        %140 = vector.broadcast %cst_55 : f32 to vector<1x128xf32>
        %141 = arith.maximumf %137, %140 : vector<1x128xf32>
        %142 = math.rsqrt %141 : vector<1x128xf32>
        %143 = arith.mulf %139, %142 : vector<1x128xf32>
        %144 = vector.extract_strided_slice %66 {offsets = [3, 0], sizes = [1, 128], strides = [1, 1]} : vector<8x128xf32> to vector<1x128xf32>
        %145 = vector.extract_strided_slice %64 {offsets = [3, 0], sizes = [1, 128], strides = [1, 1]} : vector<8x128xf32> to vector<1x128xf32>
        %146 = arith.mulf %144, %143 : vector<1x128xf32>
        %cst_56 = arith.constant 1.000000e+00 : f32
        %147 = vector.broadcast %cst_56 : f32 to vector<1x128xf32>
        %148 = arith.subf %147, %144 : vector<1x128xf32>
        %149 = arith.mulf %148, %145 : vector<1x128xf32>
        %150 = arith.addf %146, %149 : vector<1x128xf32>
        %151 = vector.extract_strided_slice %62 {offsets = [0, 3], sizes = [8, 1], strides = [1, 1]} : vector<8x8xf32> to vector<8x1xf32>
        %152 = arith.subf %150, %145 : vector<1x128xf32>
        %153 = vector.broadcast %151 : vector<8x1xf32> to vector<8x128xf32>
        %154 = vector.broadcast %152 : vector<1x128xf32> to vector<8x128xf32>
        %155 = arith.mulf %153, %154 : vector<8x128xf32>
        %156 = arith.addf %134, %155 : vector<8x128xf32>
        %157 = vector.extract_strided_slice %156 {offsets = [4, 0], sizes = [1, 128], strides = [1, 1]} : vector<8x128xf32> to vector<1x128xf32>
        %158 = arith.mulf %157, %157 : vector<1x128xf32>
        %cst_57 = arith.constant dense<0.000000e+00> : vector<1x128xf32>
        %159 = tpu.matmul %158, %0, %cst_57 {dimension_numbers = #tpu.dot_dimension_numbers<[1], [0], [0], [1], [0, 0, 1, 1], [], []>} : vector<1x128xf32>, vector<128x128xf32>, vector<1x128xf32> -> vector<1x128xf32>
        %cst_58 = arith.constant 0.000000e+00 : f32
        %160 = vector.broadcast %cst_58 : f32 to vector<1x128xf32>
        %161 = arith.subf %160, %157 : vector<1x128xf32>
        %cst_59 = arith.constant 1.000000e-24 : f32
        %162 = vector.broadcast %cst_59 : f32 to vector<1x128xf32>
        %163 = arith.maximumf %159, %162 : vector<1x128xf32>
        %164 = math.rsqrt %163 : vector<1x128xf32>
        %165 = arith.mulf %161, %164 : vector<1x128xf32>
        %166 = vector.extract_strided_slice %66 {offsets = [4, 0], sizes = [1, 128], strides = [1, 1]} : vector<8x128xf32> to vector<1x128xf32>
        %167 = vector.extract_strided_slice %64 {offsets = [4, 0], sizes = [1, 128], strides = [1, 1]} : vector<8x128xf32> to vector<1x128xf32>
        %168 = arith.mulf %166, %165 : vector<1x128xf32>
        %cst_60 = arith.constant 1.000000e+00 : f32
        %169 = vector.broadcast %cst_60 : f32 to vector<1x128xf32>
        %170 = arith.subf %169, %166 : vector<1x128xf32>
        %171 = arith.mulf %170, %167 : vector<1x128xf32>
        %172 = arith.addf %168, %171 : vector<1x128xf32>
        %173 = vector.extract_strided_slice %62 {offsets = [0, 4], sizes = [8, 1], strides = [1, 1]} : vector<8x8xf32> to vector<8x1xf32>
        %174 = arith.subf %172, %167 : vector<1x128xf32>
        %175 = vector.broadcast %173 : vector<8x1xf32> to vector<8x128xf32>
        %176 = vector.broadcast %174 : vector<1x128xf32> to vector<8x128xf32>
        %177 = arith.mulf %175, %176 : vector<8x128xf32>
        %178 = arith.addf %156, %177 : vector<8x128xf32>
        %179 = vector.extract_strided_slice %178 {offsets = [5, 0], sizes = [1, 128], strides = [1, 1]} : vector<8x128xf32> to vector<1x128xf32>
        %180 = arith.mulf %179, %179 : vector<1x128xf32>
        %cst_61 = arith.constant dense<0.000000e+00> : vector<1x128xf32>
        %181 = tpu.matmul %180, %0, %cst_61 {dimension_numbers = #tpu.dot_dimension_numbers<[1], [0], [0], [1], [0, 0, 1, 1], [], []>} : vector<1x128xf32>, vector<128x128xf32>, vector<1x128xf32> -> vector<1x128xf32>
        %cst_62 = arith.constant 0.000000e+00 : f32
        %182 = vector.broadcast %cst_62 : f32 to vector<1x128xf32>
        %183 = arith.subf %182, %179 : vector<1x128xf32>
        %cst_63 = arith.constant 1.000000e-24 : f32
        %184 = vector.broadcast %cst_63 : f32 to vector<1x128xf32>
        %185 = arith.maximumf %181, %184 : vector<1x128xf32>
        %186 = math.rsqrt %185 : vector<1x128xf32>
        %187 = arith.mulf %183, %186 : vector<1x128xf32>
        %188 = vector.extract_strided_slice %66 {offsets = [5, 0], sizes = [1, 128], strides = [1, 1]} : vector<8x128xf32> to vector<1x128xf32>
        %189 = vector.extract_strided_slice %64 {offsets = [5, 0], sizes = [1, 128], strides = [1, 1]} : vector<8x128xf32> to vector<1x128xf32>
        %190 = arith.mulf %188, %187 : vector<1x128xf32>
        %cst_64 = arith.constant 1.000000e+00 : f32
        %191 = vector.broadcast %cst_64 : f32 to vector<1x128xf32>
        %192 = arith.subf %191, %188 : vector<1x128xf32>
        %193 = arith.mulf %192, %189 : vector<1x128xf32>
        %194 = arith.addf %190, %193 : vector<1x128xf32>
        %195 = vector.extract_strided_slice %62 {offsets = [0, 5], sizes = [8, 1], strides = [1, 1]} : vector<8x8xf32> to vector<8x1xf32>
        %196 = arith.subf %194, %189 : vector<1x128xf32>
        %197 = vector.broadcast %195 : vector<8x1xf32> to vector<8x128xf32>
        %198 = vector.broadcast %196 : vector<1x128xf32> to vector<8x128xf32>
        %199 = arith.mulf %197, %198 : vector<8x128xf32>
        %200 = arith.addf %178, %199 : vector<8x128xf32>
        %201 = vector.extract_strided_slice %200 {offsets = [6, 0], sizes = [1, 128], strides = [1, 1]} : vector<8x128xf32> to vector<1x128xf32>
        %202 = arith.mulf %201, %201 : vector<1x128xf32>
        %cst_65 = arith.constant dense<0.000000e+00> : vector<1x128xf32>
        %203 = tpu.matmul %202, %0, %cst_65 {dimension_numbers = #tpu.dot_dimension_numbers<[1], [0], [0], [1], [0, 0, 1, 1], [], []>} : vector<1x128xf32>, vector<128x128xf32>, vector<1x128xf32> -> vector<1x128xf32>
        %cst_66 = arith.constant 0.000000e+00 : f32
        %204 = vector.broadcast %cst_66 : f32 to vector<1x128xf32>
        %205 = arith.subf %204, %201 : vector<1x128xf32>
        %cst_67 = arith.constant 1.000000e-24 : f32
        %206 = vector.broadcast %cst_67 : f32 to vector<1x128xf32>
        %207 = arith.maximumf %203, %206 : vector<1x128xf32>
        %208 = math.rsqrt %207 : vector<1x128xf32>
        %209 = arith.mulf %205, %208 : vector<1x128xf32>
        %210 = vector.extract_strided_slice %66 {offsets = [6, 0], sizes = [1, 128], strides = [1, 1]} : vector<8x128xf32> to vector<1x128xf32>
        %211 = vector.extract_strided_slice %64 {offsets = [6, 0], sizes = [1, 128], strides = [1, 1]} : vector<8x128xf32> to vector<1x128xf32>
        %212 = arith.mulf %210, %209 : vector<1x128xf32>
        %cst_68 = arith.constant 1.000000e+00 : f32
        %213 = vector.broadcast %cst_68 : f32 to vector<1x128xf32>
        %214 = arith.subf %213, %210 : vector<1x128xf32>
        %215 = arith.mulf %214, %211 : vector<1x128xf32>
        %216 = arith.addf %212, %215 : vector<1x128xf32>
        %217 = vector.extract_strided_slice %62 {offsets = [0, 6], sizes = [8, 1], strides = [1, 1]} : vector<8x8xf32> to vector<8x1xf32>
        %218 = arith.subf %216, %211 : vector<1x128xf32>
        %219 = vector.broadcast %217 : vector<8x1xf32> to vector<8x128xf32>
        %220 = vector.broadcast %218 : vector<1x128xf32> to vector<8x128xf32>
        %221 = arith.mulf %219, %220 : vector<8x128xf32>
        %222 = arith.addf %200, %221 : vector<8x128xf32>
        %223 = vector.extract_strided_slice %222 {offsets = [7, 0], sizes = [1, 128], strides = [1, 1]} : vector<8x128xf32> to vector<1x128xf32>
        %224 = arith.mulf %223, %223 : vector<1x128xf32>
        %cst_69 = arith.constant dense<0.000000e+00> : vector<1x128xf32>
        %225 = tpu.matmul %224, %0, %cst_69 {dimension_numbers = #tpu.dot_dimension_numbers<[1], [0], [0], [1], [0, 0, 1, 1], [], []>} : vector<1x128xf32>, vector<128x128xf32>, vector<1x128xf32> -> vector<1x128xf32>
        %cst_70 = arith.constant 0.000000e+00 : f32
        %226 = vector.broadcast %cst_70 : f32 to vector<1x128xf32>
        %227 = arith.subf %226, %223 : vector<1x128xf32>
        %cst_71 = arith.constant 1.000000e-24 : f32
        %228 = vector.broadcast %cst_71 : f32 to vector<1x128xf32>
        %229 = arith.maximumf %225, %228 : vector<1x128xf32>
        %230 = math.rsqrt %229 : vector<1x128xf32>
        %231 = arith.mulf %227, %230 : vector<1x128xf32>
        %232 = vector.extract_strided_slice %66 {offsets = [7, 0], sizes = [1, 128], strides = [1, 1]} : vector<8x128xf32> to vector<1x128xf32>
        %233 = vector.extract_strided_slice %64 {offsets = [7, 0], sizes = [1, 128], strides = [1, 1]} : vector<8x128xf32> to vector<1x128xf32>
        %234 = arith.mulf %232, %231 : vector<1x128xf32>
        %cst_72 = arith.constant 1.000000e+00 : f32
        %235 = vector.broadcast %cst_72 : f32 to vector<1x128xf32>
        %236 = arith.subf %235, %232 : vector<1x128xf32>
        %237 = arith.mulf %236, %233 : vector<1x128xf32>
        %238 = arith.addf %234, %237 : vector<1x128xf32>
        %239 = tpu.concatenate %84, %106, %128, %150, %172, %194, %216, %238 in 0 : vector<1x128xf32>, vector<1x128xf32>, vector<1x128xf32>, vector<1x128xf32>, vector<1x128xf32>, vector<1x128xf32>, vector<1x128xf32>, vector<1x128xf32> -> vector<8x128xf32>
        %240 = arith.index_cast %58 : i32 to index
        %c0_73 = arith.constant 0 : index
        %241 = vector.load %arg9[%240, %c0_73] : memref<32x128xf32, #tpu.memory_space<vmem>>, vector<8x128xf32>
        tpu.vector_store %arg9[%240, %c0_73], %239 {strides = array<i32>} : memref<32x128xf32, #tpu.memory_space<vmem>>, vector<8x128xf32>,
      }
      %c4_i32_33 = arith.constant 4 : i32
    }
    %c0_21 = arith.constant 0 : index
    %c0_22 = arith.constant 0 : index
    %44 = vector.load %arg9[%c0_21, %c0_22] : memref<32x128xf32, #tpu.memory_space<vmem>>, vector<32x128xf32>
    %c0_23 = arith.constant 0 : index
    %c0_24 = arith.constant 0 : index
    %45 = vector.load %arg9[%c0_23, %c0_24] : memref<32x128xf32, #tpu.memory_space<vmem>>, vector<1x128xf32>
    %46 = vector.broadcast %45 : vector<1x128xf32> to vector<32x128xf32>
    %47 = arith.mulf %44, %46 : vector<32x128xf32>
    %cst_25 = arith.constant dense<0.000000e+00> : vector<32x128xf32>
    %48 = tpu.matmul %47, %0, %cst_25 {dimension_numbers = #tpu.dot_dimension_numbers<[1], [0], [0], [1], [0, 0, 1, 1], [], []>} : vector<32x128xf32>, vector<128x128xf32>, vector<32x128xf32> -> vector<32x128xf32>
    %cst_26 = arith.constant 0.000000e+00 : f32
    %49 = vector.broadcast %cst_26 : f32 to vector<32x128xf32>
    %50 = arith.subf %49, %48 : vector<32x128xf32>
    %cst_27 = arith.constant -1.000000e+00 : f32
    %cst_28 = arith.constant 1.000000e+00 : f32
    %51 = vector.broadcast %cst_27 : f32 to vector<32x128xf32>
    %52 = arith.maximumf %51, %50 : vector<32x128xf32>
    %53 = vector.broadcast %cst_28 : f32 to vector<32x128xf32>
    %54 = arith.minimumf %53, %52 : vector<32x128xf32>
    %c0_29 = arith.constant 0 : index
    %c0_30 = arith.constant 0 : index
    %55 = vector.load %arg8[%c0_29, %c0_30] : memref<32x128xf32, #tpu.memory_space<vmem>>, vector<32x128xf32>
    tpu.vector_store %arg8[%c0_29, %c0_30], %54 {strides = array<i32>} : memref<32x128xf32, #tpu.memory_space<vmem>>, vector<32x128xf32>,
    return
  }
  func.func @transform_0(%arg0: i32) -> (i32, i32) {
    %c0_i32 = arith.constant 0 : i32
    %c0_i32_0 = arith.constant 0 : i32
    %c0_i32_1 = arith.constant 0 : i32
    return %c0_i32, %c0_i32_0 : i32, i32
  }
  func.func @transform_1(%arg0: i32) -> (i32, i32) {
    %c0_i32 = arith.constant 0 : i32
    %c0_i32_0 = arith.constant 0 : i32
    %c0_i32_1 = arith.constant 0 : i32
    return %c0_i32, %c0_i32_0 : i32, i32
  }
  func.func @transform_2(%arg0: i32) -> (i32, i32) {
    %c0_i32 = arith.constant 0 : i32
    %c0_i32_0 = arith.constant 0 : i32
    %c0_i32_1 = arith.constant 0 : i32
    return %c0_i32, %c0_i32_0 : i32, i32
  }
  func.func @transform_3(%arg0: i32) -> (i32, i32) {
    %c0_i32 = arith.constant 0 : i32
    %c0_i32_0 = arith.constant 0 : i32
    return %c0_i32, %arg0 : i32, i32
  }
  func.func @transform_4(%arg0: i32) -> (i32, i32) {
    %c0_i32 = arith.constant 0 : i32
    %c0_i32_0 = arith.constant 0 : i32
    return %c0_i32, %arg0 : i32, i32
  }
  func.func @transform_5(%arg0: i32) -> (i32, i32) {
    %c0_i32 = arith.constant 0 : i32
    %c0_i32_0 = arith.constant 0 : i32
    return %c0_i32, %arg0 : i32, i32
  }
  func.func @transform_6(%arg0: i32) -> (i32, i32) {
    %c0_i32 = arith.constant 0 : i32
    %c0_i32_0 = arith.constant 0 : i32
    return %c0_i32, %arg0 : i32, i32
  }
  func.func @transform_7(%arg0: i32) -> (i32, i32) {
    %c0_i32 = arith.constant 0 : i32
    %c0_i32_0 = arith.constant 0 : i32
    return %c0_i32, %arg0 : i32, i32
  }
}

</mosaic_0001>

<bundles_post_ra>
// kernel: tpu_custom_call.1
= control target key start
LH: loop header
LB: loop body
LE: loop exit
PB: predicated region body
PF: predicated region fallthrough
CT: control target
= control target key end

     0   :  { %12 = vsyncpa [#allocation4], 0  ;;  %s1829_s0 = inlined_call_operand.vmem [shape: f32[32,32], index: 0, kind: input, shape index: {}]   ;;  %s1830_s1 = inlined_call_operand.vmem [shape: f32[32,8], index: 1, kind: input, shape index: {}]   ;;  %s1831_s2 = inlined_call_operand.hbm [shape: f32[128,128], index: 2, kind: input, shape index: {}]   ;;  %s1832_s3 = inlined_call_operand.hbm [shape: f32[32,128], index: 3, kind: input, shape index: {}]   ;;  %s1833_s4 = inlined_call_operand.hbm [shape: f32[32,128], index: 4, kind: input, shape index: {}]   ;;  %s1834_s5 = inlined_call_operand.hbm [shape: f32[32,128], index: 5, kind: input, shape index: {}]   ;;  %s1835_s6 = inlined_call_operand.hbm [shape: f32[32,128], index: 6, kind: input, shape index: {}]   ;;  %s1836_s7 = inlined_call_operand.hbm [shape: f32[32,128], index: 7, kind: output, shape index: {}]  }
   0x1   :  { %13 = vsyncpa [#allocation7], 0 }
   0x2   :  { %14 = vsyncpa [#allocation10], 0 }
   0x3   :  { %15 = vsyncpa [#allocation5], 0  ;;  %s37_s26 = sshll.u32 %s1832_s3, 4  ;;  %s1244_s27 = smov [#allocation6]   ;;  %s38_s26 = int_to_ptr.hbm [resolvable:$true] %s37_s26 }
   0x4   :  { %s39_s28 = sshll.u32 %s1244_s27, 4  ;;  %s63_s8 = sshll.u32 %s1834_s5, 4  ;;  %s40_s28 = int_to_ptr.vmem [resolvable:$true] %s39_s28  ;;  %s64_s8 = int_to_ptr.hbm [resolvable:$true] %s63_s8 }
   0x5   :  { %s1245_s9 = smov 128   ;;  %s1246_s10 = smov 8  }
   0x6   :  { %45 = dma.hbm_to_vmem [thread:$0]  %s38_s26, 512, %s40_s28, [#allocation7], %s1245_s9, %s1245_s9, %s1246_s10  }
   0x7   :  { %s1247_s11 = smov [#allocation9]   ;;  %s24_s3 = sshll.u32 %s1831_s2, 4  ;;  %s25_s3 = int_to_ptr.hbm [resolvable:$true] %s24_s3 }
   0x8   :  { %s65_s12 = sshll.u32 %s1247_s11, 4  ;;  %s50_s16 = sshll.u32 %s1833_s4, 4  ;;  %s66_s12 = int_to_ptr.vmem [resolvable:$true] %s65_s12  ;;  %s51_s16 = int_to_ptr.hbm [resolvable:$true] %s50_s16 }
   0x9   :  { %71 = dma.hbm_to_vmem [thread:$0]  %s64_s8, 512, %s66_s12, [#allocation10], %s1245_s9, %s1245_s9, %s1246_s10  }
   0xa   :  { %s1248_s17 = smov [#allocation3]   ;;  %s1249_s19 = smov [#allocation8]  }
   0xb   :  { %s26_s18 = sshll.u32 %s1248_s17, 4  ;;  %s52_s2 = sshll.u32 %s1249_s19, 4  ;;  %s27_s18 = int_to_ptr.vmem [resolvable:$true] %s26_s18  ;;  %s53_s2 = int_to_ptr.vmem [resolvable:$true] %s52_s2 }
   0xc   :  { %32 = dma.hbm_to_vmem [thread:$0]  %s25_s3, 2048, %s27_s18, [#allocation4], %s1245_s9, %s1245_s9, %s1246_s10  }
   0xd   :  { %s76_s22 = sshll.u32 %s1835_s6, 4  ;;  %s1250_s4 = smov [#allocation11]   ;;  %s77_s22 = int_to_ptr.hbm [resolvable:$true] %s76_s22 }
   0xe   :  { %58 = dma.hbm_to_vmem [thread:$0]  %s51_s16, 512, %s53_s2, [#allocation7], %s1245_s9, %s1245_s9, %s1246_s10  }
   0xf   :  { %s78_s23 = sshll.u32 %s1250_s4, 4  ;;  %s79_s23 = int_to_ptr.vmem [resolvable:$true] %s78_s23 }
  0x10   :  { %84 = dma.hbm_to_vmem [thread:$0]  %s77_s22, 512, %s79_s23, [#allocation10], %s1245_s9, %s1245_s9, %s1246_s10  }
  0x11   :  { %1228 = dma.done.wait [#allocation4], 2048  }
  0x12   :  { %1229 = vsyncadd [#allocation4], 4294965248 }
  0x13   :  { %1230 = dma.done.wait [#allocation7], 1024  }
  0x14   :  { %1231 = vsyncadd [#allocation7], 4294966272 }
  0x15   :  { %1232 = dma.done.wait [#allocation10], 1024  }
  0x16   :  { %1233 = vsyncadd [#allocation10], 4294966272  ;;  %v1329_v0 = vld [vmem:[#allocation3 + $0x78] sm:$0xff]  ;;  %v1331_v1 = vld [vmem:[#allocation3 + $0x70] sm:$0xff]  ;;  %s1558_s6 = smov 0  }
  0x17   :  { %130 = vmatpush.msra.mxu0 %v1329_v0  ;;  %166 = vmatpush.msra.mxu1 %v1329_v0  ;;  %v1335_v2 = vld [vmem:[#allocation3 + $0x68] sm:$0xff]  ;;  %v1341_v3 = vld [vmem:[#allocation3 + $0x60] sm:$0xff]  ;;  %v1347_v4 = vld [vmem:[#allocation3 + $0x58] sm:$0xff] }
  0x18   :  { %283 = vmatpush.msra.mxu3 %v1329_v0  ;;  %207 = vmatpush.msra.mxu2 %v1329_v0  ;;  %v1353_v5 = vld [vmem:[#allocation3 + $0x50] sm:$0xff]  ;;  %v1359_v6 = vld [vmem:[#allocation3 + $0x48] sm:$0xff]  ;;  %v1365_v7 = vld [vmem:[#allocation3 + $0x40] sm:$0xff] }
  0x19   :  { %131 = vmatpush.msra.mxu0 %v1331_v1  ;;  %167 = vmatpush.msra.mxu1 %v1331_v1  ;;  %v1371_v8 = vld [vmem:[#allocation3 + $0x38] sm:$0xff]  ;;  %v1377_v9 = vld [vmem:[#allocation3 + $0x30] sm:$0xff]  ;;  %v1383_v10 = vld [vmem:[#allocation3 + $0x28] sm:$0xff] }
  0x1a   :  { %284 = vmatpush.msra.mxu3 %v1331_v1  ;;  %208 = vmatpush.msra.mxu2 %v1331_v1  ;;  %v1389_v11 = vld [vmem:[#allocation3 + $0x20] sm:$0xff]  ;;  %v1395_v12 = vld [vmem:[#allocation3 + $0x18] sm:$0xff]  ;;  %v1401_v13 = vld [vmem:[#allocation3 + $0x10] sm:$0xff] }
  0x1b   :  { %132 = vmatpush.msra.mxu0 %v1335_v2  ;;  %168 = vmatpush.msra.mxu1 %v1335_v2  ;;  %v1406_v14 = vld [vmem:[#allocation11] sm:$0xff]  ;;  %v1409_v15 = vld [vmem:[#allocation3 + $0x8] sm:$0xff]  ;;  %v1441_v32 = vld [vmem:[#allocation11 + $0x10] sm:$0xff] }
  0x1c   :  { %285 = vmatpush.msra.mxu3 %v1335_v2  ;;  %209 = vmatpush.msra.mxu2 %v1335_v2  ;;  %v1415_v16 = vld [vmem:[#allocation3] sm:$0xff]  ;;  %v129_v17 = vmul.f32 %v1406_v14, %v1406_v14  ;;  %v1437_v30 = vld [vmem:[#allocation11 + $0x8] sm:$0xff]  ;;  %v1445_v34 = vld [vmem:[#allocation11 + $0x18] sm:$0xff]  ;;  %v281_v37 = vmul.f32 %v1441_v32, %v1441_v32 }
  0x1d   :  { %133 = vmatpush.msra.mxu0 %v1341_v3  ;;  %169 = vmatpush.msra.mxu1 %v1341_v3  ;;  %v280_v36 = vmul.f32 %v1437_v30, %v1437_v30  ;;  %v282_v38 = vmul.f32 %v1445_v34, %v1445_v34 }
  0x1e   :  { %286 = vmatpush.msra.mxu3 %v1341_v3  ;;  %210 = vmatpush.msra.mxu2 %v1341_v3 }
  0x1f   :  { %134 = vmatpush.msra.mxu0 %v1347_v4  ;;  %170 = vmatpush.msra.mxu1 %v1347_v4 }
  0x20   :  { %287 = vmatpush.msra.mxu3 %v1347_v4  ;;  %211 = vmatpush.msra.mxu2 %v1347_v4 }
  0x21   :  { %135 = vmatpush.msra.mxu0 %v1353_v5  ;;  %171 = vmatpush.msra.mxu1 %v1353_v5 }
  0x22   :  { %288 = vmatpush.msra.mxu3 %v1353_v5  ;;  %212 = vmatpush.msra.mxu2 %v1353_v5 }
  0x23   :  { %136 = vmatpush.msra.mxu0 %v1359_v6  ;;  %172 = vmatpush.msra.mxu1 %v1359_v6 }
  0x24   :  { %289 = vmatpush.msra.mxu3 %v1359_v6  ;;  %213 = vmatpush.msra.mxu2 %v1359_v6 }
  0x25   :  { %137 = vmatpush.msra.mxu0 %v1365_v7  ;;  %173 = vmatpush.msra.mxu1 %v1365_v7 }
  0x26   :  { %290 = vmatpush.msra.mxu3 %v1365_v7  ;;  %214 = vmatpush.msra.mxu2 %v1365_v7 }
  0x27   :  { %138 = vmatpush.msra.mxu0 %v1371_v8  ;;  %174 = vmatpush.msra.mxu1 %v1371_v8 }
  0x28   :  { %291 = vmatpush.msra.mxu3 %v1371_v8  ;;  %215 = vmatpush.msra.mxu2 %v1371_v8 }
  0x29   :  { %139 = vmatpush.msra.mxu0 %v1377_v9  ;;  %175 = vmatpush.msra.mxu1 %v1377_v9 }
  0x2a   :  { %292 = vmatpush.msra.mxu3 %v1377_v9  ;;  %216 = vmatpush.msra.mxu2 %v1377_v9 }
  0x2b   :  { %140 = vmatpush.msra.mxu0 %v1383_v10  ;;  %176 = vmatpush.msra.mxu1 %v1383_v10 }
  0x2c   :  { %293 = vmatpush.msra.mxu3 %v1383_v10  ;;  %217 = vmatpush.msra.mxu2 %v1383_v10 }
  0x2d   :  { %141 = vmatpush.msra.mxu0 %v1389_v11  ;;  %177 = vmatpush.msra.mxu1 %v1389_v11 }
  0x2e   :  { %294 = vmatpush.msra.mxu3 %v1389_v11  ;;  %218 = vmatpush.msra.mxu2 %v1389_v11 }
  0x2f   :  { %142 = vmatpush.msra.mxu0 %v1395_v12  ;;  %178 = vmatpush.msra.mxu1 %v1395_v12 }
  0x30   :  { %295 = vmatpush.msra.mxu3 %v1395_v12  ;;  %219 = vmatpush.msra.mxu2 %v1395_v12 }
  0x31   :  { %143 = vmatpush.msra.mxu0 %v1401_v13  ;;  %179 = vmatpush.msra.mxu1 %v1401_v13 }
  0x32   :  { %296 = vmatpush.msra.mxu3 %v1401_v13  ;;  %220 = vmatpush.msra.mxu2 %v1401_v13 }
  0x33   :  { %144 = vmatpush.msra.mxu0 %v1409_v15  ;;  %180 = vmatpush.msra.mxu1 %v1409_v15 }
  0x34   :  { %297 = vmatpush.msra.mxu3 %v1409_v15  ;;  %221 = vmatpush.msra.mxu2 %v1409_v15 }
  0x35   :  { %145 = vmatpush.msra.mxu0 %v1415_v16  ;;  %181 = vmatpush.msra.mxu1 %v1415_v16 }
  0x36   :  { %146 = vmatmul.f32.vlgmr.msra.gmra.mxu0 %v129_v17  ;;  %298 = vmatpush.msra.mxu3 %v1415_v16 }
  0x37   :  { %299 = vmatmul.f32.vlgmr.msra.gmra.mxu3 %v129_v17  ;;  %222 = vmatpush.msra.mxu2 %v1415_v16 }
  0x3f   :  { %302 = vmatmul.f32.gmra.mxu3 %v280_v36 }
  0x47   :  { %305 = vmatmul.f32.gmra.mxu3 %v281_v37 }
  0x4f   :  { %308 = vmatmul.f32.gmra.mxu3 %v282_v38 }
  0xb3   :  { %v147_v18 = vpop.f32.mrf.mxu0 }
  0xb4   :  { %v148_v19 = vadd.f32 1e-12, %v147_v18 }
  0xb6   :  { %1033 = vrsqrt.f32 %v148_v19  ;;  %vm156_vm1 = vweird.f32 %v148_v19 }
  0xba   :  { %v300_v55 = vpop.f32.mrf.mxu3 }
  0xbb   :  { %v301_v56 = vadd.f32 1e-12, %v300_v55 }
  0xbc   :  { %v1034_v20 = vpop.eup %1033 }
  0xbd   :  { %v151_v21 = vmul.f32 %v1034_v20, %v148_v19  ;;  %vm157_vm0 = vweird.f32 %v1034_v20  ;;  %1035 = vrsqrt.f32 %v301_v56  ;;  %vm318_vm3 = vweird.f32 %v301_v56 }
  0xbe   :  { %vm158_vm2 = vmor %vm156_vm1, %vm157_vm0 }
  0xbf   :  { %v152_v22 = vmul.f32 %v1034_v20, %v151_v21 }
  0xc1   :  { %v153_v23 = vmul.f32 0.5, %v152_v22 }
  0xc2   :  { %v303_v57 = vpop.f32.mrf.mxu3 }
  0xc3   :  { %v154_v24 = vsub.f32 1.5, %v153_v23  ;;  %v1479_v58 = vadd.f32 1e-12, %v303_v57  ;;  %v1036_v59 = vpop.eup %1035  ;;  %v368_v57 = vld [vmem:[#allocation8] sm:$0xff] }
  0xc4   :  { %v313_v61 = vmul.f32 %v1036_v59, %v301_v56  ;;  %vm319_vm4 = vweird.f32 %v1036_v59 }
  0xc5   :  { %v155_v25 = vmul.f32 %v1034_v20, %v154_v24  ;;  %1037 = vrsqrt.f32 %v1479_v58  ;;  %vm1497_vm6 = vmor %vm318_vm3, %vm319_vm4  ;;  %vm328_vm9 = vweird.f32 %v1479_v58 }
  0xc6   :  { %v314_v19 = vmul.f32 %v1036_v59, %v313_v61 }
  0xc7   :  { %v159_v26 = vsel %vm158_vm2, %v1034_v20, %v155_v25 }
  0xc8   :  { %v1430_v27 = vmul.f32 %v159_v26, %v1406_v14  ;;  %v315_v21 = vmul.f32 0.5, %v314_v19  ;;  %v125_v19 = vld [vmem:[#allocation9] sm:$0xff] }
  0xca   :  { %v1433_v28 = vperm.slane %v1430_v27, 0  ;;  %v306_v60 = vpop.f32.mrf.mxu3 }
  0xcb   :  { %v1482_v17 = vadd.f32 1e-12, %v306_v60  ;;  %v1484_v18 = vpop.eup %1037 }
  0xcc   :  { %v162_v29 = vmul.f32 %v1433_v28, %v1406_v14  ;;  %v163_v31 = vmul.f32 %v1433_v28, %v1437_v30  ;;  %v164_v33 = vmul.f32 %v1433_v28, %v1441_v32  ;;  %v165_v35 = vmul.f32 %v1433_v28, %v1445_v34 }
  0xcd   :  { %v323_v20 = vmul.f32 %v1484_v18, %v1479_v58  ;;  %vm329_vm10 = vweird.f32 %v1484_v18  ;;  %vm338_vm15 = vweird.f32 %v1482_v17 }
  0xce   :  { %182 = vmatmul.f32.vlgmr.msra.gmra.mxu1 %v162_v29  ;;  %vm1515_vm11 = vmor %vm328_vm9, %vm329_vm10 }
  0xcf   :  { %v324_v29 = vmul.f32 %v1484_v18, %v323_v20 }
  0xd1   :  { %v325_v38 = vmul.f32 0.5, %v324_v29 }
  0xd2   :  { %v309_v23 = vpop.f32.mrf.mxu3 }
  0xd6   :  { %185 = vmatmul.f32.gmra.mxu1 %v163_v31  ;;  %v1490_v31 = vadd.f32 1e-12, %v309_v23 }
  0xde   :  { %188 = vmatmul.f32.gmra.mxu1 %v164_v33  ;;  %v316_v33 = vsub.f32 1.5, %v315_v21 }
  0xe6   :  { %191 = vmatmul.f32.gmra.mxu1 %v165_v35 }
 0x14b   :  { %v183_v39 = vpop.f32.mrf.mxu1 }
 0x14c   :  { %v195_v40 = vmul.f32 %v183_v39, %v1433_v28  ;;  %v356_v39 = vld [vmem:[#allocation6] sm:$0xff] }
 0x14e   :  { %v1457_v41 = vsub.f32 %v1406_v14, %v195_v40  ;;  %v317_v40 = vmul.f32 %v1036_v59, %v316_v33 }
 0x150   :  { %v203_v42 = vmul.f32 %v1457_v41, %v1457_v41  ;;  %v321_v55 = vsel %vm1497_vm6, %v1036_v59, %v317_v40  ;;  %v384_v59 = vsub.f32 1.0, %v125_v19 }
 0x152   :  { %223 = vmatmul.f32.vlgmr.msra.gmra.mxu2 %v203_v42 }
 0x153   :  { %v186_v43 = vpop.f32.mrf.mxu1 }
 0x154   :  { %v196_v44 = vmul.f32 %v186_v43, %v1433_v28 }
 0x156   :  { %v1463_v45 = vsub.f32 %v1437_v30, %v196_v44 }
 0x158   :  { %v204_v46 = vmul.f32 %v1463_v45, %v1463_v45 }
 0x15a   :  { %226 = vmatmul.f32.gmra.mxu2 %v204_v46 }
 0x15b   :  { %v189_v47 = vpop.f32.mrf.mxu1 }
 0x15c   :  { %v197_v48 = vmul.f32 %v189_v47, %v1433_v28 }
 0x15e   :  { %v1469_v49 = vsub.f32 %v1441_v32, %v197_v48 }
 0x160   :  { %v205_v50 = vmul.f32 %v1469_v49, %v1469_v49 }
 0x162   :  { %229 = vmatmul.f32.gmra.mxu2 %v205_v50 }
 0x163   :  { %v192_v51 = vpop.f32.mrf.mxu1 }
 0x164   :  { %v198_v52 = vmul.f32 %v192_v51, %v1433_v28  ;;  %v360_v51 = vsub.f32 0.0, %v356_v39 }
 0x166   :  { %v1475_v53 = vsub.f32 %v1445_v34, %v198_v52  ;;  %v364_v20 = vmul.f32 %v360_v51, %v1433_v28 }
 0x168   :  { %v206_v54 = vmul.f32 %v1475_v53, %v1475_v53 }
 0x16a   :  { %232 = vmatmul.f32.gmra.mxu2 %v206_v54  ;;  %v326_v54 = vsub.f32 1.5, %v325_v38 }
 0x16c   :  { %v327_v23 = vmul.f32 %v1484_v18, %v326_v54 }
 0x1d5   :  { %v224_v62 = vpop.f32.mrf.mxu2 }
 0x1d6   :  { %v225_v63 = vadd.f32 1e-12, %v224_v62 }
 0x1d8   :  { %1039 = vrsqrt.f32 %v225_v63  ;;  %vm242_vm7 = vweird.f32 %v225_v63 }
 0x1d9   :  { %1041 = vrsqrt.f32 %v1482_v17 }
 0x1dd   :  { %v227_v22 = vpop.f32.mrf.mxu2 }
 0x1de   :  { %v1040_v24 = vpop.eup %1039  ;;  %v228_v25 = vadd.f32 1e-12, %v227_v22  ;;  %v352_v22 = vmul.f32 %v321_v55, %v1406_v14 }
 0x1df   :  { %v237_v26 = vmul.f32 %v1040_v24, %v225_v63  ;;  %v1492_v36 = vpop.eup %1041  ;;  %vm243_vm5 = vweird.f32 %v1040_v24 }
 0x1e0   :  { %1043 = vrsqrt.f32 %v228_v25  ;;  %v333_v43 = vmul.f32 %v1492_v36, %v1482_v17  ;;  %vm244_vm8 = vmor %vm242_vm7, %vm243_vm5  ;;  %vm252_vm13 = vweird.f32 %v228_v25  ;;  %vm339_vm0 = vweird.f32 %v1492_v36 }
 0x1e1   :  { %v238_v35 = vmul.f32 %v1040_v24, %v237_v26  ;;  %1045 = vrsqrt.f32 %v1490_v31  ;;  %v357_v26 = vld [vmem:[#allocation6 + $0x8] sm:$0xff]  ;;  %vm1538_vm2 = vmor %vm338_vm15, %vm339_vm0  ;;  %vm348_vm5 = vweird.f32 %v1490_v31 }
 0x1e2   :  { %v334_v60 = vmul.f32 %v1492_v36, %v333_v43  ;;  %v361_v40 = vsub.f32 0.0, %v357_v26  ;;  %v380_v43 = vmul.f32 %v352_v22, %v125_v19 }
 0x1e3   :  { %v239_v37 = vmul.f32 0.5, %v238_v35 }
 0x1e4   :  { %v335_v58 = vmul.f32 0.5, %v334_v60 }
 0x1e5   :  { %v240_v42 = vsub.f32 1.5, %v239_v37  ;;  %v230_v44 = vpop.f32.mrf.mxu2 }
 0x1e6   :  { %v1044_v46 = vpop.eup %1043  ;;  %v1501_v48 = vadd.f32 1e-12, %v230_v44  ;;  %v331_v44 = vsel %vm1515_vm11, %v1484_v18, %v327_v23 }
 0x1e7   :  { %v241_v50 = vmul.f32 %v1040_v24, %v240_v42  ;;  %v247_v52 = vmul.f32 %v1044_v46, %v228_v25  ;;  %v1507_v62 = vpop.eup %1045  ;;  %vm253_vm12 = vweird.f32 %v1044_v46  ;;  %v353_v18 = vmul.f32 %v331_v44, %v1437_v30 }
 0x1e8   :  { %1047 = vrsqrt.f32 %v1501_v48  ;;  %vm254_vm14 = vmor %vm252_vm13, %vm253_vm12  ;;  %vm262_vm3 = vweird.f32 %v1501_v48  ;;  %vm349_vm6 = vweird.f32 %v1507_v62 }
 0x1e9   :  { %v245_v56 = vsel %vm244_vm8, %v1040_v24, %v241_v50  ;;  %v248_v61 = vmul.f32 %v1044_v46, %v247_v52  ;;  %v336_v50 = vsub.f32 1.5, %v335_v58  ;;  %v369_v52 = vld [vmem:[#allocation8 + $0x8] sm:$0xff]  ;;  %vm350_vm8 = vmor %vm348_vm5, %vm349_vm6 }
 0x1ea   :  { %v276_v63 = vmul.f32 %v245_v56, %v1457_v41  ;;  %v343_v41 = vmul.f32 %v1507_v62, %v1490_v31 }
 0x1eb   :  { %v249_v21 = vmul.f32 0.5, %v248_v61  ;;  %v337_v19 = vmul.f32 %v1492_v36, %v336_v50  ;;  %v359_v50 = vld [vmem:[#allocation6 + $0x18] sm:$0xff] }
 0x1ec   :  { %v372_v24 = vmul.f32 %v368_v57, %v276_v63  ;;  %v344_v54 = vmul.f32 %v1507_v62, %v343_v41  ;;  %v126_v57 = vld [vmem:[#allocation9 + $0x8] sm:$0xff]  ;;  %v365_v63 = vmul.f32 %v361_v40, %v1433_v28  ;;  %v370_v41 = vld [vmem:[#allocation8 + $0x10] sm:$0xff] }
 0x1ed   :  { %v250_v33 = vsub.f32 1.5, %v249_v21  ;;  %v233_v35 = vpop.f32.mrf.mxu2  ;;  %v385_v61 = vsub.f32 1.0, %v126_v57  ;;  %v341_v58 = vsel %vm1538_vm2, %v1492_v36, %v337_v19  ;;  %v127_v40 = vld [vmem:[#allocation9 + $0x10] sm:$0xff] }
 0x1ee   :  { %v1048_v37 = vpop.eup %1047  ;;  %v376_v38 = vadd.f32 %v372_v24, %v364_v20  ;;  %v1521_v39 = vadd.f32 1e-12, %v233_v35  ;;  %v345_v20 = vmul.f32 0.5, %v344_v54  ;;  %v363_v54 = vsub.f32 0.0, %v359_v50 }
 0x1ef   :  { %v251_v14 = vmul.f32 %v1044_v46, %v250_v33  ;;  %v257_v42 = vmul.f32 %v1048_v37, %v1501_v48  ;;  %vm263_vm1 = vweird.f32 %v1048_v37 }
 0x1f0   :  { %v388_v47 = vmul.f32 %v384_v59, %v376_v38  ;;  %1049 = vrsqrt.f32 %v1521_v39  ;;  %vm264_vm4 = vmor %vm262_vm3, %vm263_vm1  ;;  %v346_v33 = vsub.f32 1.5, %v345_v20  ;;  %vm272_vm9 = vweird.f32 %v1521_v39 }
 0x1f1   :  { %v255_v51 = vsel %vm254_vm14, %v1044_v46, %v251_v14  ;;  %v258_v55 = vmul.f32 %v1048_v37, %v257_v42  ;;  %v354_v42 = vmul.f32 %v341_v58, %v1441_v32 }
 0x1f2   :  { %v392_v56 = vadd.f32 %v388_v47, %v380_v43  ;;  %v277_v25 = vmul.f32 %v255_v51, %v1463_v45  ;;  %v358_v45 = vld [vmem:[#allocation6 + $0x10] sm:$0xff]  ;;  %v386_v43 = vsub.f32 1.0, %v127_v40 }
 0x1f3   :  { %v259_v60 = vmul.f32 0.5, %v258_v55  ;;  %v362_v29 = vsub.f32 0.0, %v358_v45  ;;  %v382_v31 = vmul.f32 %v354_v42, %v127_v40 }
 0x1f4   :  { %396 = vst [vmem:[#allocation2] sm:$0xff] %v392_v56  ;;  %v373_v46 = vmul.f32 %v369_v52, %v277_v25  ;;  %v371_v56 = vld [vmem:[#allocation8 + $0x18] sm:$0xff] }
 0x1f5   :  { %400 = vst [vmem:[#allocation2] sm:$0x1] %v1430_v27  ;;  %v260_v21 = vsub.f32 1.5, %v259_v60  ;;  %v381_v27 = vmul.f32 %v353_v18, %v126_v57  ;;  %v366_v44 = vmul.f32 %v362_v29, %v1433_v28  ;;  %v128_v60 = vld [vmem:[#allocation9 + $0x18] sm:$0xff] }
 0x1f6   :  { %v1050_v22 = vpop.eup %1049  ;;  %v377_v30 = vadd.f32 %v373_v46, %v365_v63  ;;  %v367_v63 = vmul.f32 %v363_v54, %v1433_v28 }
 0x1f7   :  { %v261_v23 = vmul.f32 %v1048_v37, %v260_v21  ;;  %v267_v24 = vmul.f32 %v1050_v22, %v1521_v39  ;;  %vm273_vm7 = vweird.f32 %v1050_v22 }
 0x1f8   :  { %v389_v26 = vmul.f32 %v385_v61, %v377_v30  ;;  %vm274_vm10 = vmor %vm272_vm9, %vm273_vm7  ;;  %v387_v61 = vsub.f32 1.0, %v128_v60 }
 0x1f9   :  { %v265_v17 = vsel %vm264_vm4, %v1048_v37, %v261_v23  ;;  %v268_v35 = vmul.f32 %v1050_v22, %v267_v24  ;;  %v347_v37 = vmul.f32 %v1507_v62, %v346_v33 }
 0x1fa   :  { %v393_v38 = vadd.f32 %v389_v26, %v381_v27  ;;  %v278_v14 = vmul.f32 %v265_v17, %v1469_v49 }
 0x1fb   :  { %v269_v48 = vmul.f32 0.5, %v268_v35  ;;  %v351_v32 = vsel %vm350_vm8, %v1507_v62, %v347_v37 }
 0x1fc   :  { %397 = vst [vmem:[#allocation2 + $0x8] sm:$0xff] %v393_v38  ;;  %v374_v36 = vmul.f32 %v370_v41, %v278_v14  ;;  %v355_v18 = vmul.f32 %v351_v32, %v1445_v34 }
 0x1fd   :  { %v270_v47 = vsub.f32 1.5, %v269_v48 }
 0x1fe   :  { %v378_v49 = vadd.f32 %v374_v36, %v366_v44  ;;  %v383_v19 = vmul.f32 %v355_v18, %v128_v60 }
 0x1ff   :  { %v271_v51 = vmul.f32 %v1050_v22, %v270_v47 }
 0x200   :  { %v390_v52 = vmul.f32 %v386_v43, %v378_v49 }
 0x201   :  { %v275_v55 = vsel %vm274_vm10, %v1050_v22, %v271_v51 }
 0x202   :  { %v394_v25 = vadd.f32 %v390_v52, %v382_v31  ;;  %v279_v57 = vmul.f32 %v275_v55, %v1475_v53 }
 0x204   :  { %398 = vst [vmem:[#allocation2 + $0x10] sm:$0xff] %v394_v25  ;;  %v375_v46 = vmul.f32 %v371_v56, %v279_v57 }
 0x206   :  { %v379_v39 = vadd.f32 %v375_v46, %v367_v63 }
 0x208   :  { %v391_v20 = vmul.f32 %v387_v61, %v379_v39 }
 0x20a   :  { %v395_v21 = vadd.f32 %v391_v20, %v383_v19 }
 0x20c   :  { %399 = vst [vmem:[#allocation2 + $0x18] sm:$0xff] %v395_v21 }
 0x20d LB: > { %s1563_s24 = smov 0   ;;  %s1238_s6 = sphi %s1558_s6, %s406_s6  }
 0x20e LB: >> { %v424_v34 = vld [vmem:[#allocation2 + $0x10] sm:$0xff]  ;;  %451 = vmatpush.msra.mxu1 %v1329_v0  ;;  %501 = vmatpush.msra.mxu2 %v1329_v0  ;;  %v423_v53 = vld [vmem:[#allocation2 + $0x8] sm:$0xff]  ;;  %s1572_s25 = sshll.u32 %s1242_s24, 3  ;;  %v422_v62 = vld [vmem:[#allocation2] sm:$0xff]  ;;  %vm426_vm11 = vcmask 261120   ;;  %v1251_v59 = vmov 0   ;;  %s1242_s24 = sphi %s1563_s24, %s412_s24  }
 0x20f   : >> { %551 = vmatpush.msra.mxu3 %v1329_v0  ;;  %s414_s28 = scalar_lea.vmem %s1829_s0, %s1572_s25  ;;  %s416_s8 = scalar_lea.vmem %s1830_s1, %s1572_s25  ;;  %1051 = vset.pattern.permute.xlu0 %v1251_v59  ;;  %v1252_v26 = vmov 1   ;;  %v1253_v57 = vmov 2   ;;  %vm839_vm5 = vcmask 1040384   ;;  %vm841_vm6 = vcmask 1041408  }
 0x210   : >> { %452 = vmatpush.msra.mxu1 %v1331_v1  ;;  %502 = vmatpush.msra.mxu2 %v1331_v1  ;;  %v415_v45 = vld [vmem:[%s414_s28] sm:$0xff]  ;;  %s420_s11 = scalar_lea.vmem [#allocation9], %s1572_s25  ;;  %s418_s12 = scalar_lea.vmem [#allocation2], %s1572_s25  ;;  %vm843_vm10 = vcmask 1042432  }
 0x211   : >> { %552 = vmatpush.msra.mxu3 %v1331_v1  ;;  %v1707_v22 = vld [vmem:[%s416_s8] sm:$0xff]  ;;  %1053 = vset.pattern.permute.xlu1 %v1253_v57  ;;  %s412_s24 = sadd.s32 1, %s1242_s24  }
 0x212   : >> { %453 = vmatpush.msra.mxu1 %v1335_v2  ;;  %503 = vmatpush.msra.mxu2 %v1335_v2  ;;  %v1712_v17 = vld [vmem:[%s420_s11] sm:$0xff]  ;;  %p409_p0 = scmp.ge.s32.totalorder %s412_s24, 4  }
 0x213   : >> { %v425_v28 = vld [vmem:[#allocation2 + $0x18] sm:$0xff]  ;;  %553 = vmatpush.msra.mxu3 %v1335_v2  ;;  %491 = vperm.xlu0 %1051, %v1707_v22   ;;  %v485_v38 = vsub.f32 1.0, %v1712_v17  ;;  %v1718_v14 = vld [vmem:[%s418_s12] sm:$0xff]  ;;  %s406_s6 = sadd.s32 (%p409_p0), 1, %s1238_s6  }
 0x214   : >> { %442 = vmatpush.msra.mxu0 %v425_v28  ;;  %454 = vmatpush.msra.mxu1 %v1341_v3  ;;  %p403_p1 = scmp.ge.s32.totalorder (%p409_p0), %s406_s6, 40  }
 0x215   : >> { %504 = vmatpush.msra.mxu2 %v1341_v3  ;;  %554 = vmatpush.msra.mxu3 %v1341_v3  ;;  %v1721_v43 = vmul.f32 %v485_v38, %v1718_v14 }
 0x216   : >> { %443 = vmatpush.msra.mxu0 %v424_v34  ;;  %455 = vmatpush.msra.mxu1 %v1347_v4 }
 0x217   : >> { %505 = vmatpush.msra.mxu2 %v1347_v4  ;;  %555 = vmatpush.msra.mxu3 %v1347_v4 }
 0x218   : >> { %444 = vmatpush.msra.mxu0 %v423_v53  ;;  %456 = vmatpush.msra.mxu1 %v1353_v5 }
 0x219   : >> { %506 = vmatpush.msra.mxu2 %v1353_v5  ;;  %556 = vmatpush.msra.mxu3 %v1353_v5 }
 0x21a   : >> { %445 = vmatpush.msra.mxu0 %v422_v62  ;;  %457 = vmatpush.msra.mxu1 %v1359_v6 }
 0x21b   : >> { %949 = vmatmul.msk.f32.vlgmr.msra.gmra.mxu0 %vm426_vm11, %v415_v45  ;;  %507 = vmatpush.msra.mxu2 %v1359_v6 }
 0x21c   : >> { %601 = vmatpush.msrb.mxu0 %v1329_v0  ;;  %557 = vmatpush.msra.mxu3 %v1359_v6 }
 0x21d   : >> { %458 = vmatpush.msra.mxu1 %v1365_v7  ;;  %508 = vmatpush.msra.mxu2 %v1365_v7 }
 0x21e   : >> { %602 = vmatpush.msrb.mxu0 %v1331_v1  ;;  %558 = vmatpush.msra.mxu3 %v1365_v7 }
 0x21f   : >> { %459 = vmatpush.msra.mxu1 %v1371_v8  ;;  %509 = vmatpush.msra.mxu2 %v1371_v8 }
 0x220   : >> { %603 = vmatpush.msrb.mxu0 %v1335_v2  ;;  %559 = vmatpush.msra.mxu3 %v1371_v8 }
 0x221   : >> { %460 = vmatpush.msra.mxu1 %v1377_v9  ;;  %510 = vmatpush.msra.mxu2 %v1377_v9 }
 0x222   : >> { %604 = vmatpush.msrb.mxu0 %v1341_v3  ;;  %560 = vmatpush.msra.mxu3 %v1377_v9 }
 0x223   : >> { %461 = vmatpush.msra.mxu1 %v1383_v10  ;;  %511 = vmatpush.msra.mxu2 %v1383_v10 }
 0x224   : >> { %605 = vmatpush.msrb.mxu0 %v1347_v4  ;;  %561 = vmatpush.msra.mxu3 %v1383_v10 }
 0x225   : >> { %462 = vmatpush.msra.mxu1 %v1389_v11  ;;  %512 = vmatpush.msra.mxu2 %v1389_v11 }
 0x226   : >> { %606 = vmatpush.msrb.mxu0 %v1353_v5  ;;  %562 = vmatpush.msra.mxu3 %v1389_v11 }
 0x227   : >> { %463 = vmatpush.msra.mxu1 %v1395_v12  ;;  %513 = vmatpush.msra.mxu2 %v1395_v12 }
 0x228   : >> { %607 = vmatpush.msrb.mxu0 %v1359_v6  ;;  %563 = vmatpush.msra.mxu3 %v1395_v12 }
 0x229   : >> { %464 = vmatpush.msra.mxu1 %v1401_v13  ;;  %514 = vmatpush.msra.mxu2 %v1401_v13 }
 0x22a   : >> { %608 = vmatpush.msrb.mxu0 %v1365_v7  ;;  %564 = vmatpush.msra.mxu3 %v1401_v13 }
 0x22b   : >> { %465 = vmatpush.msra.mxu1 %v1409_v15  ;;  %515 = vmatpush.msra.mxu2 %v1409_v15 }
 0x22c   : >> { %609 = vmatpush.msrb.mxu0 %v1371_v8  ;;  %565 = vmatpush.msra.mxu3 %v1409_v15 }
 0x22d   : >> { %466 = vmatpush.msra.mxu1 %v1415_v16  ;;  %516 = vmatpush.msra.mxu2 %v1415_v16 }
 0x22e   : >> { %610 = vmatpush.msrb.mxu0 %v1377_v9  ;;  %566 = vmatpush.msra.mxu3 %v1415_v16 }
 0x22f   : >> { %651 = vmatpush.msrb.mxu1 %v1329_v0  ;;  %701 = vmatpush.msrb.mxu2 %v1329_v0 }
 0x230   : >> { %611 = vmatpush.msrb.mxu0 %v1383_v10  ;;  %751 = vmatpush.msrb.mxu3 %v1329_v0 }
 0x231   : >> { %652 = vmatpush.msrb.mxu1 %v1331_v1  ;;  %702 = vmatpush.msrb.mxu2 %v1331_v1 }
 0x232   : >> { %612 = vmatpush.msrb.mxu0 %v1389_v11  ;;  %752 = vmatpush.msrb.mxu3 %v1331_v1 }
 0x233   : >> { %653 = vmatpush.msrb.mxu1 %v1335_v2  ;;  %703 = vmatpush.msrb.mxu2 %v1335_v2 }
 0x234   : >> { %613 = vmatpush.msrb.mxu0 %v1395_v12  ;;  %753 = vmatpush.msrb.mxu3 %v1335_v2 }
 0x235   : >> { %654 = vmatpush.msrb.mxu1 %v1341_v3  ;;  %704 = vmatpush.msrb.mxu2 %v1341_v3 }
 0x236   : >> { %614 = vmatpush.msrb.mxu0 %v1401_v13  ;;  %754 = vmatpush.msrb.mxu3 %v1341_v3 }
 0x237   : >> { %655 = vmatpush.msrb.mxu1 %v1347_v4  ;;  %705 = vmatpush.msrb.mxu2 %v1347_v4 }
 0x238   : >> { %615 = vmatpush.msrb.mxu0 %v1409_v15  ;;  %755 = vmatpush.msrb.mxu3 %v1347_v4 }
 0x239   : >> { %656 = vmatpush.msrb.mxu1 %v1353_v5  ;;  %706 = vmatpush.msrb.mxu2 %v1353_v5 }
 0x23a   : >> { %616 = vmatpush.msrb.mxu0 %v1415_v16  ;;  %756 = vmatpush.msrb.mxu3 %v1353_v5 }
 0x23b   : >> { %657 = vmatpush.msrb.mxu1 %v1359_v6  ;;  %707 = vmatpush.msrb.mxu2 %v1359_v6 }
 0x23c   : >> { %801 = vmatpush.msra.mxu0 %v1329_v0  ;;  %757 = vmatpush.msrb.mxu3 %v1359_v6 }
 0x23d   : >> { %658 = vmatpush.msrb.mxu1 %v1365_v7  ;;  %708 = vmatpush.msrb.mxu2 %v1365_v7 }
 0x23e   : >> { %802 = vmatpush.msra.mxu0 %v1331_v1  ;;  %758 = vmatpush.msrb.mxu3 %v1365_v7 }
 0x23f   : >> { %659 = vmatpush.msrb.mxu1 %v1371_v8  ;;  %709 = vmatpush.msrb.mxu2 %v1371_v8 }
 0x240   : >> { %803 = vmatpush.msra.mxu0 %v1335_v2  ;;  %759 = vmatpush.msrb.mxu3 %v1371_v8 }
 0x241   : >> { %660 = vmatpush.msrb.mxu1 %v1377_v9  ;;  %710 = vmatpush.msrb.mxu2 %v1377_v9 }
 0x242   : >> { %804 = vmatpush.msra.mxu0 %v1341_v3  ;;  %760 = vmatpush.msrb.mxu3 %v1377_v9 }
 0x243   : >> { %661 = vmatpush.msrb.mxu1 %v1383_v10  ;;  %711 = vmatpush.msrb.mxu2 %v1383_v10 }
 0x244   : >> { %805 = vmatpush.msra.mxu0 %v1347_v4  ;;  %761 = vmatpush.msrb.mxu3 %v1383_v10 }
 0x245   : >> { %662 = vmatpush.msrb.mxu1 %v1389_v11  ;;  %712 = vmatpush.msrb.mxu2 %v1389_v11 }
 0x246   : >> { %806 = vmatpush.msra.mxu0 %v1353_v5  ;;  %762 = vmatpush.msrb.mxu3 %v1389_v11 }
 0x247   : >> { %663 = vmatpush.msrb.mxu1 %v1395_v12  ;;  %713 = vmatpush.msrb.mxu2 %v1395_v12 }
 0x248   : >> { %807 = vmatpush.msra.mxu0 %v1359_v6  ;;  %763 = vmatpush.msrb.mxu3 %v1395_v12 }
 0x249   : >> { %664 = vmatpush.msrb.mxu1 %v1401_v13  ;;  %714 = vmatpush.msrb.mxu2 %v1401_v13 }
 0x24a   : >> { %808 = vmatpush.msra.mxu0 %v1365_v7  ;;  %764 = vmatpush.msrb.mxu3 %v1401_v13 }
 0x24b   : >> { %665 = vmatpush.msrb.mxu1 %v1409_v15  ;;  %715 = vmatpush.msrb.mxu2 %v1409_v15 }
 0x24c   : >> { %809 = vmatpush.msra.mxu0 %v1371_v8  ;;  %765 = vmatpush.msrb.mxu3 %v1409_v15 }
 0x24d   : >> { %666 = vmatpush.msrb.mxu1 %v1415_v16  ;;  %716 = vmatpush.msrb.mxu2 %v1415_v16 }
 0x24e   : >> { %810 = vmatpush.msra.mxu0 %v1377_v9  ;;  %766 = vmatpush.msrb.mxu3 %v1415_v16 }
 0x24f   : >> { %1052 = vset.pattern.permute.xlu0 %v1252_v26  ;;  %591 = vperm.xlu1 %1053, %v1707_v22  }
 0x250   : >> { %811 = vmatpush.msra.mxu0 %v1383_v10  ;;  %541 = vperm.xlu0 %1052, %v1707_v22  }
 0x252   : >> { %812 = vmatpush.msra.mxu0 %v1389_v11 }
 0x254   : >> { %813 = vmatpush.msra.mxu0 %v1395_v12 }
 0x256   : >> { %814 = vmatpush.msra.mxu0 %v1401_v13 }
 0x258   : >> { %815 = vmatpush.msra.mxu0 %v1409_v15 }
 0x25a   : >> { %816 = vmatpush.msra.mxu0 %v1415_v16 }
 0x285   : >> { %v492_v50 = vpop.permute.xlu0 %491 }
 0x298   : >> { %v447_v30 = vpop.f32.mrf.mxu0 }
 0x299   : >> { %v450_v23 = vmul.f32 %v447_v30, %v447_v30  ;;  %v471_v48 = vsub.f32 0.0, %v447_v30 }
 0x29b   : >> { %467 = vmatmul.f32.vlgmr.msra.gmra.mxu1 %v450_v23 }
 0x2c2   : >> { %v542_v53 = vpop.permute.xlu0 %541 }
 0x318   : >> { %v468_v24 = vpop.f32.mrf.mxu1 }
 0x319   : >> { %v472_v27 = vmax.f32 %v468_v24, 1e-24 }
 0x31b   : >> { %1059 = vrsqrt.f32 %v472_v27  ;;  %vm479_vm13 = vweird.f32 %v472_v27 }
 0x321   : >> { %v1060_v29 = vpop.eup %1059 }
 0x322   : >> { %v474_v58 = vmul.f32 %v1060_v29, %v472_v27  ;;  %vm480_vm12 = vweird.f32 %v1060_v29 }
 0x323   : >> { %vm481_vm14 = vmor %vm479_vm13, %vm480_vm12 }
 0x324   : >> { %v475_v33 = vmul.f32 %v1060_v29, %v474_v58  ;;  %v1254_v58 = vmov 3  }
 0x325   : >> { %1054 = vset.pattern.permute.xlu1 %v1254_v58 }
 0x326   : >> { %v476_v41 = vmul.f32 0.5, %v475_v33  ;;  %641 = vperm.xlu1 %1054, %v1707_v22  }
 0x328   : >> { %v477_v35 = vsub.f32 1.5, %v476_v41 }
 0x32a   : >> { %v478_v40 = vmul.f32 %v1060_v29, %v477_v35 }
 0x32c   : >> { %v482_v42 = vsel %vm481_vm14, %v1060_v29, %v478_v40  ;;  %vm845_vm14 = vcmask 1043456  }
 0x32d   : >> { %v483_v44 = vmul.f32 %v482_v42, %v471_v48 }
 0x32f   : >> { %v484_v36 = vmul.f32 %v483_v44, %v1712_v17 }
 0x331   : >> { %v487_v37 = vadd.f32 %v1721_v43, %v484_v36 }
 0x333   : >> { %v488_v47 = vsub.f32 %v487_v37, %v1718_v14 }
 0x335   : >> { %v494_v49 = vperm.slane %v488_v47, 0 }
 0x337   : >> { %v495_v51 = vmul.f32 %v494_v49, %v492_v50 }
 0x339   : >> { %v496_v31 = vadd.f32 %v495_v51, %v447_v30 }
 0x33b   : >> { %v497_v52 = vmul.f32 %v496_v31, %v496_v31  ;;  %v521_v39 = vsub.f32 0.0, %v496_v31 }
 0x33d   : >> { %v499_v54 = vrot.slane %v497_v52, 1 }
 0x33f   : >> { %517 = vmatmul.f32.vlgmr.msra.gmra.mxu2 %v499_v54 }
 0x3c2   : >> { %v518_v32 = vpop.f32.mrf.mxu2 }
 0x3c3   : >> { %v522_v55 = vmax.f32 %v518_v32, 1e-24 }
 0x3c5   : >> { %1061 = vrsqrt.f32 %v522_v55  ;;  %vm529_vm0 = vweird.f32 %v522_v55 }
 0x3cb   : >> { %v1062_v56 = vpop.eup %1061 }
 0x3cc   : >> { %v524_v25 = vmul.f32 %v1062_v56, %v522_v55  ;;  %vm530_vm15 = vweird.f32 %v1062_v56 }
 0x3cd   : >> { %vm531_vm1 = vmor %vm529_vm0, %vm530_vm15 }
 0x3ce   : >> { %v525_v60 = vmul.f32 %v1062_v56, %v524_v25 }
 0x3d0   : >> { %v526_v18 = vmul.f32 0.5, %v525_v60 }
 0x3d2   : >> { %v527_v61 = vsub.f32 1.5, %v526_v18 }
 0x3d4   : >> { %v528_v63 = vmul.f32 %v1062_v56, %v527_v61  ;;  %v1255_v61 = vmov 4  }
 0x3d5   : >> { %1055 = vset.pattern.permute.xlu2 %v1255_v61 }
 0x3d6   : >> { %v532_v46 = vsel %vm531_vm1, %v1062_v56, %v528_v63  ;;  %691 = vperm.xlu2 %1055, %v1707_v22  }
 0x3d7   : >> { %v534_v19 = vrot.slane %v532_v46, 7 }
 0x3d9   : >> { %v536_v20 = vmul.f32 %v534_v19, %v521_v39 }
 0x3db   : >> { %v537_v21 = vmul.f32 %v536_v20, %v1712_v17 }
 0x3dd   : >> { %v538_v28 = vadd.f32 %v537_v21, %v1721_v43 }
 0x3df   : >> { %v539_v34 = vsub.f32 %v538_v28, %v1718_v14  ;;  %v840_v50 = vsel %vm839_vm5, %v487_v37, %v538_v28 }
 0x3e1   : >> { %v544_v62 = vperm.slane %v539_v34, 1 }
 0x3e3   : >> { %v545_v45 = vmul.f32 %v544_v62, %v542_v53 }
 0x3e5   : >> { %v546_v59 = vadd.f32 %v545_v45, %v496_v31  ;;  %v592_v31 = vpop.permute.xlu1 %591 }
 0x3e7   : >> { %v547_v30 = vmul.f32 %v546_v59, %v546_v59  ;;  %v571_v48 = vsub.f32 0.0, %v546_v59 }
 0x3e9   : >> { %v549_v23 = vrot.slane %v547_v30, 2 }
 0x3eb   : >> { %567 = vmatmul.f32.vlgmr.msra.gmra.mxu3 %v549_v23 }
 0x46e   : >> { %v568_v24 = vpop.f32.mrf.mxu3 }
 0x46f   : >> { %v572_v27 = vmax.f32 %v568_v24, 1e-24 }
 0x471   : >> { %1063 = vrsqrt.f32 %v572_v27  ;;  %vm579_vm3 = vweird.f32 %v572_v27 }
 0x477   : >> { %v1064_v26 = vpop.eup %1063 }
 0x478   : >> { %v574_v29 = vmul.f32 %v1064_v26, %v572_v27  ;;  %vm580_vm2 = vweird.f32 %v1064_v26 }
 0x479   : >> { %vm581_vm4 = vmor %vm579_vm3, %vm580_vm2  ;;  %vm847_vm2 = vcmask 1044480  }
 0x47a   : >> { %v575_v33 = vmul.f32 %v1064_v26, %v574_v29 }
 0x47c   : >> { %v576_v41 = vmul.f32 0.5, %v575_v33 }
 0x47e   : >> { %v577_v35 = vsub.f32 1.5, %v576_v41 }
 0x480   : >> { %v578_v38 = vmul.f32 %v1064_v26, %v577_v35  ;;  %v1256_v35 = vmov 5  }
 0x481   : >> { %1056 = vset.pattern.permute.xlu2 %v1256_v35 }
 0x482   : >> { %v582_v40 = vsel %vm581_vm4, %v1064_v26, %v578_v38  ;;  %741 = vperm.xlu2 %1056, %v1707_v22  }
 0x483   : >> { %v584_v42 = vrot.slane %v582_v40, 6 }
 0x485   : >> { %v586_v44 = vmul.f32 %v584_v42, %v571_v48 }
 0x487   : >> { %v587_v36 = vmul.f32 %v586_v44, %v1712_v17 }
 0x489   : >> { %v588_v47 = vadd.f32 %v587_v36, %v1721_v43 }
 0x48b   : >> { %v589_v49 = vsub.f32 %v588_v47, %v1718_v14  ;;  %v842_v51 = vsel %vm841_vm6, %v840_v50, %v588_v47  ;;  %vm849_vm6 = vcmask 1045504  }
 0x48d   : >> { %v594_v52 = vperm.slane %v589_v49, 2 }
 0x48f   : >> { %v595_v54 = vmul.f32 %v594_v52, %v592_v31 }
 0x491   : >> { %v596_v32 = vadd.f32 %v595_v54, %v546_v59  ;;  %v642_v59 = vpop.permute.xlu1 %641  ;;  %v692_v54 = vpop.permute.xlu2 %691 }
 0x493   : >> { %v597_v55 = vmul.f32 %v596_v32, %v596_v32  ;;  %v621_v20 = vsub.f32 0.0, %v596_v32 }
 0x495   : >> { %v599_v56 = vrot.slane %v597_v55, 3 }
 0x497   : >> { %617 = vmatmul.f32.vlgmr.msrb.gmra.mxu0 %v599_v56 }
 0x514   : >> { %v618_v25 = vpop.f32.mrf.mxu0 }
 0x515   : >> { %v622_v57 = vmax.f32 %v618_v25, 1e-24 }
 0x517   : >> { %1065 = vrsqrt.f32 %v622_v57  ;;  %vm629_vm8 = vweird.f32 %v622_v57 }
 0x51d   : >> { %v1066_v60 = vpop.eup %1065 }
 0x51e   : >> { %v624_v18 = vmul.f32 %v1066_v60, %v622_v57  ;;  %vm630_vm7 = vweird.f32 %v1066_v60 }
 0x51f   : >> { %vm631_vm9 = vmor %vm629_vm8, %vm630_vm7 }
 0x520   : >> { %v625_v37 = vmul.f32 %v1066_v60, %v624_v18 }
 0x522   : >> { %v626_v63 = vmul.f32 0.5, %v625_v37 }
 0x524   : >> { %v627_v46 = vsub.f32 1.5, %v626_v63  ;;  %v1257_v63 = vmov 6  }
 0x525   : >> { %1057 = vset.pattern.permute.xlu1 %v1257_v63  ;;  %1058 = vset.pattern.permute.xlu0 %v1257_v63 }
 0x526   : >> { %v628_v39 = vmul.f32 %v1066_v60, %v627_v46  ;;  %791 = vperm.xlu1 %1057, %v1707_v22   ;;  %v742_v22 = vpop.permute.xlu2 %741 }
 0x528   : >> { %v632_v19 = vsel %vm631_vm9, %v1066_v60, %v628_v39 }
 0x529   : >> { %v634_v21 = vrot.slane %v632_v19, 5 }
 0x52b   : >> { %v636_v28 = vmul.f32 %v634_v21, %v621_v20 }
 0x52d   : >> { %v637_v34 = vmul.f32 %v636_v28, %v1712_v17 }
 0x52f   : >> { %v638_v53 = vadd.f32 %v637_v34, %v1721_v43 }
 0x531   : >> { %v639_v62 = vsub.f32 %v638_v53, %v1718_v14  ;;  %v844_v45 = vsel %vm843_vm10, %v842_v51, %v638_v53  ;;  %vm851_vm10 = vcmask 1046528  }
 0x533   : >> { %v644_v30 = vperm.slane %v639_v62, 3 }
 0x535   : >> { %v645_v23 = vmul.f32 %v644_v30, %v642_v59 }
 0x537   : >> { %v646_v24 = vadd.f32 %v645_v23, %v596_v32 }
 0x539   : >> { %v647_v27 = vmul.f32 %v646_v24, %v646_v24  ;;  %v671_v36 = vsub.f32 0.0, %v646_v24 }
 0x53b   : >> { %v649_v26 = vrot.slane %v647_v27, 4 }
 0x53d   : >> { %667 = vmatmul.f32.vlgmr.msrb.gmra.mxu1 %v649_v26 }
 0x5ba   : >> { %v668_v29 = vpop.f32.mrf.mxu1 }
 0x5bb   : >> { %v672_v58 = vmax.f32 %v668_v29, 1e-24 }
 0x5bd   : >> { %1067 = vrsqrt.f32 %v672_v58  ;;  %vm679_vm12 = vweird.f32 %v672_v58 }
 0x5c3   : >> { %v1068_v33 = vpop.eup %1067 }
 0x5c4   : >> { %v674_v41 = vmul.f32 %v1068_v33, %v672_v58  ;;  %vm680_vm11 = vweird.f32 %v1068_v33 }
 0x5c5   : >> { %vm681_vm13 = vmor %vm679_vm12, %vm680_vm11 }
 0x5c6   : >> { %v675_v38 = vmul.f32 %v1068_v33, %v674_v41 }
 0x5c8   : >> { %v676_v40 = vmul.f32 0.5, %v675_v38 }
 0x5ca   : >> { %v677_v48 = vsub.f32 1.5, %v676_v40 }
 0x5cc   : >> { %v678_v42 = vmul.f32 %v1068_v33, %v677_v48 }
 0x5ce   : >> { %v682_v44 = vsel %vm681_vm13, %v1068_v33, %v678_v42 }
 0x5cf   : >> { %v684_v47 = vrot.slane %v682_v44, 4 }
 0x5d1   : >> { %v686_v50 = vmul.f32 %v684_v47, %v671_v36 }
 0x5d3   : >> { %v687_v49 = vmul.f32 %v686_v50, %v1712_v17 }
 0x5d5   : >> { %v688_v51 = vadd.f32 %v687_v49, %v1721_v43 }
 0x5d7   : >> { %v689_v31 = vsub.f32 %v688_v51, %v1718_v14  ;;  %v846_v52 = vsel %vm845_vm14, %v844_v45, %v688_v51 }
 0x5d9   : >> { %v694_v32 = vperm.slane %v689_v31, 4 }
 0x5db   : >> { %v695_v55 = vmul.f32 %v694_v32, %v692_v54  ;;  %v792_v54 = vpop.permute.xlu1 %791 }
 0x5dd   : >> { %v696_v56 = vadd.f32 %v695_v55, %v646_v24 }
 0x5df   : >> { %v697_v25 = vmul.f32 %v696_v56, %v696_v56  ;;  %v721_v28 = vsub.f32 0.0, %v696_v56 }
 0x5e1   : >> { %v699_v57 = vrot.slane %v697_v25, 5 }
 0x5e3   : >> { %717 = vmatmul.f32.vlgmr.msrb.gmra.mxu2 %v699_v57 }
 0x666   : >> { %v718_v60 = vpop.f32.mrf.mxu2 }
 0x667   : >> { %v722_v18 = vmax.f32 %v718_v60, 1e-24 }
 0x669   : >> { %1069 = vrsqrt.f32 %v722_v18  ;;  %vm729_vm0 = vweird.f32 %v722_v18 }
 0x66f   : >> { %v1070_v61 = vpop.eup %1069 }
 0x670   : >> { %v724_v37 = vmul.f32 %v1070_v61, %v722_v18  ;;  %vm730_vm15 = vweird.f32 %v1070_v61 }
 0x671   : >> { %vm731_vm1 = vmor %vm729_vm0, %vm730_vm15 }
 0x672   : >> { %v725_v46 = vmul.f32 %v1070_v61, %v724_v37 }
 0x674   : >> { %v726_v39 = vmul.f32 0.5, %v725_v46 }
 0x676   : >> { %v727_v19 = vsub.f32 1.5, %v726_v39 }
 0x678   : >> { %v728_v20 = vmul.f32 %v1070_v61, %v727_v19 }
 0x67a   : >> { %v732_v21 = vsel %vm731_vm1, %v1070_v61, %v728_v20 }
 0x67b   : >> { %v734_v34 = vrot.slane %v732_v21, 3 }
 0x67d   : >> { %v736_v53 = vmul.f32 %v734_v34, %v721_v28 }
 0x67f   : >> { %v737_v62 = vmul.f32 %v736_v53, %v1712_v17 }
 0x681   : >> { %v738_v45 = vadd.f32 %v737_v62, %v1721_v43 }
 0x683   : >> { %v739_v59 = vsub.f32 %v738_v45, %v1718_v14  ;;  %v848_v30 = vsel %vm847_vm2, %v846_v52, %v738_v45 }
 0x685   : >> { %v744_v23 = vperm.slane %v739_v59, 5 }
 0x687   : >> { %v745_v24 = vmul.f32 %v744_v23, %v742_v22 }
 0x689   : >> { %v746_v27 = vadd.f32 %v745_v24, %v696_v56 }
 0x68b   : >> { %v747_v26 = vmul.f32 %v746_v27, %v746_v27  ;;  %v771_v36 = vsub.f32 0.0, %v746_v27 }
 0x68d   : >> { %v749_v29 = vrot.slane %v747_v26, 6 }
 0x68f   : >> { %767 = vmatmul.f32.vlgmr.msrb.gmra.mxu3 %v749_v29 }
 0x712   : >> { %v768_v58 = vpop.f32.mrf.mxu3 }
 0x713   : >> { %v772_v33 = vmax.f32 %v768_v58, 1e-24 }
 0x715   : >> { %1071 = vrsqrt.f32 %v772_v33  ;;  %vm779_vm4 = vweird.f32 %v772_v33 }
 0x71b   : >> { %v1072_v41 = vpop.eup %1071 }
 0x71c   : >> { %v774_v35 = vmul.f32 %v1072_v41, %v772_v33  ;;  %vm780_vm3 = vweird.f32 %v1072_v41 }
 0x71d   : >> { %vm781_vm5 = vmor %vm779_vm4, %vm780_vm3 }
 0x71e   : >> { %v775_v38 = vmul.f32 %v1072_v41, %v774_v35 }
 0x720   : >> { %v776_v40 = vmul.f32 0.5, %v775_v38 }
 0x722   : >> { %v777_v48 = vsub.f32 1.5, %v776_v40 }
 0x724   : >> { %v778_v42 = vmul.f32 %v1072_v41, %v777_v48 }
 0x726   : >> { %v782_v44 = vsel %vm781_vm5, %v1072_v41, %v778_v42 }
 0x727   : >> { %v784_v47 = vrot.slane %v782_v44, 2 }
 0x729   : >> { %v786_v50 = vmul.f32 %v784_v47, %v771_v36 }
 0x72b   : >> { %v787_v49 = vmul.f32 %v786_v50, %v1712_v17 }
 0x72d   : >> { %v788_v51 = vadd.f32 %v787_v49, %v1721_v43 }
 0x72f   : >> { %v789_v31 = vsub.f32 %v788_v51, %v1718_v14  ;;  %v850_v52 = vsel %vm849_vm6, %v848_v30, %v788_v51 }
 0x731   : >> { %v794_v32 = vperm.slane %v789_v31, 6 }
 0x733   : >> { %v795_v55 = vmul.f32 %v794_v32, %v792_v54 }
 0x735   : >> { %v796_v56 = vadd.f32 %v795_v55, %v746_v27 }
 0x737   : >> { %v797_v25 = vmul.f32 %v796_v56, %v796_v56  ;;  %v821_v20 = vsub.f32 0.0, %v796_v56 }
 0x739   : >> { %v799_v57 = vrot.slane %v797_v25, 7 }
 0x73b   : >> { %817 = vmatmul.f32.vlgmr.msra.gmra.mxu0 %v799_v57 }
 0x7b8   : >> { %v818_v60 = vpop.f32.mrf.mxu0 }
 0x7b9   : >> { %v822_v18 = vmax.f32 %v818_v60, 1e-24 }
 0x7bb   : >> { %1073 = vrsqrt.f32 %v822_v18  ;;  %vm829_vm8 = vweird.f32 %v822_v18 }
 0x7c1   : >> { %v1074_v61 = vpop.eup %1073 }
 0x7c2   : >> { %v824_v37 = vmul.f32 %v1074_v61, %v822_v18  ;;  %vm830_vm7 = vweird.f32 %v1074_v61 }
 0x7c3   : >> { %vm831_vm9 = vmor %vm829_vm8, %vm830_vm7 }
 0x7c4   : >> { %v825_v63 = vmul.f32 %v1074_v61, %v824_v37 }
 0x7c6   : >> { %v826_v46 = vmul.f32 0.5, %v825_v63 }
 0x7c8   : >> { %v827_v39 = vsub.f32 1.5, %v826_v46 }
 0x7ca   : >> { %v828_v19 = vmul.f32 %v1074_v61, %v827_v39 }
 0x7cc   : >> { %v832_v14 = vsel %vm831_vm9, %v1074_v61, %v828_v19 }
 0x7cd   : >> { %v834_v21 = vrot.slane %v832_v14, 1 }
 0x7cf   : >> { %v836_v28 = vmul.f32 %v834_v21, %v821_v20 }
 0x7d1   : >> { %v837_v34 = vmul.f32 %v836_v28, %v1712_v17 }
 0x7d2   : > { %411 = sbr.rel (!%p409_p0) target bundleno = 526 (0x20e), region = 86 }
 0x7d3   : >> { %v838_v53 = vadd.f32 %v837_v34, %v1721_v43 }
 0x7d5   : >> { %v852_v62 = vsel %vm851_vm10, %v850_v52, %v838_v53 }
 0x7d6   : >> { %853 = vst [vmem:[%s418_s12] sm:$0xff] %v852_v62 }
 0x7d7   :  { %955 = vmatpush.msra.mxu2 (%p403_p1), %v1329_v0  ;;  %956 = vmatpush.msra.mxu3 (%p403_p1), %v1329_v0  ;;  %s1258_s0 = smov (%p403_p1), [#allocation12]   ;;  %s915_s3 = sshll.u32 (%p403_p1), %s1836_s7, 4  ;;  %s916_s3 = int_to_ptr.hbm [resolvable:$true] %s915_s3 }
 0x7d8   :  { %864 = vmatpush.msra.mxu0 (%p403_p1), %v1329_v0  ;;  %954 = vmatpush.msra.mxu1 (%p403_p1), %v1329_v0  ;;  %s913_s1 = sshll.u32 (%p403_p1), %s1258_s0, 4  ;;  %s914_s1 = int_to_ptr.vmem [resolvable:$true] %s913_s1 }
 0x7d9   :  { %958 = vmatpush.msra.mxu2 (%p403_p1), %v1331_v1  ;;  %959 = vmatpush.msra.mxu3 (%p403_p1), %v1331_v1 }
 0x7da   :  { %405 = sbr.rel (!%p403_p1) target bundleno = 525 (0x20d), region = 97  ;;  %865 = vmatpush.msra.mxu0 (%p403_p1), %v1331_v1  ;;  %957 = vmatpush.msra.mxu1 (%p403_p1), %v1331_v1 }
 0x7db   :  { %961 = vmatpush.msra.mxu2 (%p403_p1), %v1335_v2  ;;  %962 = vmatpush.msra.mxu3 (%p403_p1), %v1335_v2 }
 0x7dc   :  { %866 = vmatpush.msra.mxu0 (%p403_p1), %v1335_v2  ;;  %960 = vmatpush.msra.mxu1 (%p403_p1), %v1335_v2 }
 0x7dd   :  { %964 = vmatpush.msra.mxu2 (%p403_p1), %v1341_v3  ;;  %965 = vmatpush.msra.mxu3 (%p403_p1), %v1341_v3  ;;  %v1075_v0 = vld [vmem:[#allocation2] ss:$0 sm:$0xff] (%p403_p1)  ;;  %v856_v1 = vld [vmem:[#allocation2 + $0x10] sm:$0xff] (%p403_p1)  ;;  %v857_v2 = vld [vmem:[#allocation2 + $0x18] sm:$0xff] (%p403_p1) }
 0x7de   :  { %867 = vmatpush.msra.mxu0 (%p403_p1), %v1341_v3  ;;  %963 = vmatpush.msra.mxu1 (%p403_p1), %v1341_v3  ;;  %v854_v3 = vld [vmem:[#allocation2] sm:$0xff] (%p403_p1) }
 0x7df   :  { %967 = vmatpush.msra.mxu2 %v1347_v4  ;;  %968 = vmatpush.msra.mxu3 %v1347_v4 }
 0x7e0   :  { %868 = vmatpush.msra.mxu0 %v1347_v4  ;;  %966 = vmatpush.msra.mxu1 %v1347_v4  ;;  %v855_v4 = vld [vmem:[#allocation2 + $0x8] sm:$0xff] }
 0x7e1   :  { %970 = vmatpush.msra.mxu2 %v1353_v5  ;;  %971 = vmatpush.msra.mxu3 %v1353_v5 }
 0x7e2   :  { %869 = vmatpush.msra.mxu0 %v1353_v5  ;;  %969 = vmatpush.msra.mxu1 %v1353_v5  ;;  %v862_v5 = vmul.f32 %v1075_v0, %v856_v1 }
 0x7e3   :  { %973 = vmatpush.msra.mxu2 %v1359_v6  ;;  %974 = vmatpush.msra.mxu3 %v1359_v6 }
 0x7e4   :  { %870 = vmatpush.msra.mxu0 %v1359_v6  ;;  %972 = vmatpush.msra.mxu1 %v1359_v6  ;;  %v863_v6 = vmul.f32 %v1075_v0, %v857_v2 }
 0x7e5   :  { %976 = vmatpush.msra.mxu2 %v1365_v7  ;;  %977 = vmatpush.msra.mxu3 %v1365_v7 }
 0x7e6   :  { %871 = vmatpush.msra.mxu0 %v1365_v7  ;;  %975 = vmatpush.msra.mxu1 %v1365_v7  ;;  %v860_v7 = vmul.f32 %v1075_v0, %v854_v3 }
 0x7e7   :  { %979 = vmatpush.msra.mxu2 %v1371_v8  ;;  %980 = vmatpush.msra.mxu3 %v1371_v8 }
 0x7e8   :  { %872 = vmatpush.msra.mxu0 %v1371_v8  ;;  %978 = vmatpush.msra.mxu1 %v1371_v8  ;;  %v861_v8 = vmul.f32 %v1075_v0, %v855_v4 }
 0x7e9   :  { %982 = vmatpush.msra.mxu2 %v1377_v9  ;;  %983 = vmatpush.msra.mxu3 %v1377_v9 }
 0x7ea   :  { %873 = vmatpush.msra.mxu0 %v1377_v9  ;;  %981 = vmatpush.msra.mxu1 %v1377_v9 }
 0x7eb   :  { %985 = vmatpush.msra.mxu2 %v1383_v10  ;;  %986 = vmatpush.msra.mxu3 %v1383_v10 }
 0x7ec   :  { %874 = vmatpush.msra.mxu0 %v1383_v10  ;;  %984 = vmatpush.msra.mxu1 %v1383_v10 }
 0x7ed   :  { %988 = vmatpush.msra.mxu2 %v1389_v11  ;;  %989 = vmatpush.msra.mxu3 %v1389_v11 }
 0x7ee   :  { %875 = vmatpush.msra.mxu0 %v1389_v11  ;;  %987 = vmatpush.msra.mxu1 %v1389_v11 }
 0x7ef   :  { %991 = vmatpush.msra.mxu2 %v1395_v12  ;;  %992 = vmatpush.msra.mxu3 %v1395_v12 }
 0x7f0   :  { %876 = vmatpush.msra.mxu0 %v1395_v12  ;;  %990 = vmatpush.msra.mxu1 %v1395_v12 }
 0x7f1   :  { %994 = vmatpush.msra.mxu2 %v1401_v13  ;;  %995 = vmatpush.msra.mxu3 %v1401_v13 }
 0x7f2   :  { %877 = vmatpush.msra.mxu0 %v1401_v13  ;;  %993 = vmatpush.msra.mxu1 %v1401_v13 }
 0x7f3   :  { %997 = vmatpush.msra.mxu2 %v1409_v15  ;;  %998 = vmatpush.msra.mxu3 %v1409_v15 }
 0x7f4   :  { %878 = vmatpush.msra.mxu0 %v1409_v15  ;;  %996 = vmatpush.msra.mxu1 %v1409_v15 }
 0x7f5   :  { %1000 = vmatpush.msra.mxu2 %v1415_v16  ;;  %1001 = vmatpush.msra.mxu3 %v1415_v16 }
 0x7f6   :  { %886 = vmatmul.f32.vlgmr.msra.gmra.mxu2 %v862_v5  ;;  %889 = vmatmul.f32.vlgmr.msra.gmra.mxu3 %v863_v6 }
 0x7f7   :  { %879 = vmatpush.msra.mxu0 %v1415_v16  ;;  %999 = vmatpush.msra.mxu1 %v1415_v16 }
 0x7f8   :  { %880 = vmatmul.f32.vlgmr.msra.gmra.mxu0 %v860_v7  ;;  %883 = vmatmul.f32.vlgmr.msra.gmra.mxu1 %v861_v8 }
 0x875   :  { %v881_v9 = vpop.f32.mrf.mxu0  ;;  %v884_v10 = vpop.f32.mrf.mxu1 }
 0x876   :  { %v893_v11 = vsub.f32 0.0, %v881_v9  ;;  %v894_v12 = vsub.f32 0.0, %v884_v10 }
 0x878   :  { %v950_v13 = vclamps-f32 %v893_v11, 1.0  ;;  %v951_v15 = vclamps-f32 %v894_v12, 1.0 }
 0x879   :  { %v887_v17 = vpop.f32.mrf.mxu2  ;;  %v890_v43 = vpop.f32.mrf.mxu3 }
 0x87a   :  { %905 = vst [vmem:[#allocation12] sm:$0xff] %v950_v13  ;;  %v895_v45 = vsub.f32 0.0, %v887_v17  ;;  %v896_v59 = vsub.f32 0.0, %v890_v43 }
 0x87b   :  { %906 = vst [vmem:[#allocation12 + $0x8] sm:$0xff] %v951_v15 }
 0x87c   :  { %v952_v16 = vclamps-f32 %v895_v45, 1.0  ;;  %v953_v30 = vclamps-f32 %v896_v59, 1.0 }
 0x87e   :  { %907 = vst [vmem:[#allocation12 + $0x10] sm:$0xff] %v952_v16 }
 0x87f   :  { %908 = vst [vmem:[#allocation12 + $0x18] sm:$0xff] %v953_v30 }
 0x880   :  { %921 = dma.vmem_to_hbm [thread:$0]  %s914_s1, 512, %s916_s3, [#allocation5], %s1245_s9, %s1245_s9, %s1246_s10  }
 0x881   :  { %1234 = dma.done.wait [#allocation5], 512  }
 0x882   :  { %1235 = vsyncadd [#allocation5], 4294966784 }
 0x883   :  { %926 = vsyncpa [#allocation4], 1 }
 0x884   :  { %927 = vsyncpa [#allocation7], 1 }
 0x885   :  { %928 = vsyncpa [#allocation10], 1 }
 0x886   :  { %929 = vsyncpa [#allocation5], 1 }

</bundles_post_ra>
